<compile_context>
chip_gen: v6e
topology: v6e:2x2x1
jax: 0.10.0
libtpu: 0.0.40
codegen_flags: <defaults>
</compile_context>

<pallas_src>
import jax
import jax.numpy as jnp
from jax.experimental import pallas as pl
from jax.experimental.pallas import tpu as pltpu

# Logical and lane-padded sizes (pad to multiples of 128 on the lane axis).
K_IN, K_PAD = 784, 896          # 28*28 -> 7*128
H1, H2 = 256, 128               # already lane-dense
H3, H3_PAD = 64, 128
OUT, OUT_PAD = 10, 128


def _round_up(x, m):
    return (x + m - 1) // m * m


def mlp_kernel(x_ref,
               w1_ref, b1_ref,
               w2_ref, b2_ref,
               w3_ref, b3_ref,
               w4_ref, b4_ref,
               out_ref):
    # One batch tile per grid step. Weights/biases have constant index_maps, so
    # they stay VMEM-resident across all grid steps (single DMA).
    x = x_ref[...]                                                       # (TB, 896) bf16

    h1 = jnp.dot(x, w1_ref[...], preferred_element_type=jnp.float32)    # (TB, 256) f32
    h1 = jnp.maximum(h1 + b1_ref[...], 0.0).astype(jnp.bfloat16)        # ReLU (+ identity dropout)

    h2 = jnp.dot(h1, w2_ref[...], preferred_element_type=jnp.float32)   # (TB, 128)
    h2 = jnp.maximum(h2 + b2_ref[...], 0.0).astype(jnp.bfloat16)

    h3 = jnp.dot(h2, w3_ref[...], preferred_element_type=jnp.float32)   # (TB, 128) padded 64->128
    h3 = jnp.maximum(h3 + b3_ref[...], 0.0).astype(jnp.bfloat16)

    out = jnp.dot(h3, w4_ref[...], preferred_element_type=jnp.float32)  # (TB, 128) padded 10->128
    out_ref[...] = out + b4_ref[...]                                     # lane-dense f32 store


def fashion_classifier_forward(x_nchw, kernel_params, *, tile_b=512):
    """x_nchw: (B, 1, 28, 28) float32. kernel_params: output of pad_params_for_kernel.

    Returns logits (B, 10) float32.
    """
    B = x_nchw.shape[0]
    x_flat = x_nchw.reshape(B, -1).astype(jnp.float32)        # nn.Flatten (row-major)

    # Batch tile: multiple of 128 (fills MXU rows); cap by padded batch size.
    TB = min(tile_b, _round_up(B, 128))
    B_pad = _round_up(B, TB)

    # Zero-pad batch and feature dims; cast activations to bf16 for the MXU.
    x_pad = jnp.zeros((B_pad, K_PAD), jnp.bfloat16)
    x_pad = x_pad.at[:B, :K_IN].set(x_flat.astype(jnp.bfloat16))

    (w1, b1), (w2, b2), (w3, b3), (w4, b4) = kernel_params

    def resident(shape):
        # Whole array as one block; constant block index -> fetched once, stays in VMEM.
        return pl.BlockSpec(shape, lambda i: (0, 0))

    flops = 2 * B_pad * (K_PAD * H1 + H1 * H2 + H2 * H3_PAD + H3_PAD * OUT_PAD)
    bytes_accessed = (
        x_pad.size * 2
        + sum(w.size * 2 + b.size * 4 for (w, b) in kernel_params)
        + B_pad * OUT_PAD * 4
    )

    out = pl.pallas_call(
        mlp_kernel,
        out_shape=jax.ShapeDtypeStruct((B_pad, OUT_PAD), jnp.float32),
        grid=(B_pad // TB,),
        in_specs=[
            pl.BlockSpec((TB, K_PAD), lambda i: (i, 0)),   # streamed batch tiles
            resident((K_PAD, H1)),   resident((1, H1)),
            resident((H1, H2)),      resident((1, H2)),
            resident((H2, H3_PAD)),  resident((1, H3_PAD)),
            resident((H3_PAD, OUT_PAD)), resident((1, OUT_PAD)),
        ],
        out_specs=pl.BlockSpec((TB, OUT_PAD), lambda i: (i, 0)),
        compiler_params=pltpu.CompilerParams(
            dimension_semantics=("parallel",),             # megacore sharding on v7x
        ),
        cost_estimate=pl.CostEstimate(
            flops=flops, transcendentals=0, bytes_accessed=bytes_accessed),
    )(x_pad, w1, b1, w2, b2, w3, b3, w4, b4)

    return out[:B, :OUT]


def init_params(key):
    """Logical (unpadded) f32 params mimicking nn.Linear default init.

    Weights stored transposed to (in, out) so the kernel computes x @ W + b,
    matching PyTorch's x @ W_pt.T + b.
    """
    sizes = [(K_IN, H1), (H1, H2), (H2, H3), (H3, OUT)]
    params = []
    for fan_in, fan_out in sizes:
        key, kw, kb = jax.random.split(key, 3)
        bound = 1.0 / jnp.sqrt(jnp.float32(fan_in))
        w = jax.random.uniform(kw, (fan_in, fan_out), jnp.float32, -bound, bound)
        b = jax.random.uniform(kb, (1, fan_out), jnp.float32, -bound, bound)
        params.append((w, b))
    return params


def pad_params_for_kernel(params):
    """Zero-pad weights/biases to lane-dense shapes; weights -> bf16, biases stay f32."""
    (w1, b1), (w2, b2), (w3, b3), (w4, b4) = params

    def pad(w, b, rows, cols):
        wp = jnp.zeros((rows, cols), jnp.float32).at[:w.shape[0], :w.shape[1]].set(w)
        bp = jnp.zeros((1, cols), jnp.float32).at[:, :b.shape[1]].set(b)
        return wp.astype(jnp.bfloat16), bp

    return [
        pad(w1, b1, K_PAD, H1),        # zero rows 784..895 -> padded x cols contribute 0
        pad(w2, b2, H1, H2),
        pad(w3, b3, H2, H3_PAD),       # zero cols 64..127 -> ReLU(0)=0 in padded h3
        pad(w4, b4, H3_PAD, OUT_PAD),  # zero rows/cols -> padded logits discarded
    ]


def reference_forward(x_nchw, params):
    """Pure-JAX reference using the same bf16-inputs / f32-accumulate precision."""
    x = x_nchw.reshape(x_nchw.shape[0], -1)
    (w1, b1), (w2, b2), (w3, b3), (w4, b4) = params

    def dense(h, w, b, relu=True):
        y = jnp.dot(h.astype(jnp.bfloat16), w.astype(jnp.bfloat16),
                    preferred_element_type=jnp.float32) + b
        return jnp.maximum(y, 0.0) if relu else y

    h = dense(x, w1, b1)
    h = dense(h, w2, b2)
    h = dense(h, w3, b3)
    return dense(h, w4, b4, relu=False)


if __name__ == "__main__":
    key = jax.random.PRNGKey(0)
    key, kx = jax.random.split(key)

    B = 8  # small batch
    x = jax.random.normal(kx, (B, 1, 28, 28), jnp.float32)  # NCHW like FashionMNIST

    params = init_params(key)
    kernel_params = pad_params_for_kernel(params)

    logits = fashion_classifier_forward(x, kernel_params)
    logits = jax.block_until_ready(logits)

    ref = reference_forward(x, params)
    assert logits.shape == (B, OUT)
    assert jnp.allclose(logits, ref, atol=1e-2, rtol=1e-2), \
        f"max abs err {float(jnp.max(jnp.abs(logits - ref)))}"

    print("KERNEL_OK")
</pallas_src>

<mosaic_0001>
module attributes {stable_mosaic.version = 11 : i64} {
  func.func @mlp_kernel(%arg0: i32, %arg1: memref<128x896xbf16, #tpu.memory_space<vmem>>, %arg2: memref<896x256xbf16, #tpu.memory_space<vmem>>, %arg3: memref<1x256xf32, #tpu.memory_space<vmem>>, %arg4: memref<256x128xbf16, #tpu.memory_space<vmem>>, %arg5: memref<1x128xf32, #tpu.memory_space<vmem>>, %arg6: memref<128x128xbf16, #tpu.memory_space<vmem>>, %arg7: memref<1x128xf32, #tpu.memory_space<vmem>>, %arg8: memref<128x128xbf16, #tpu.memory_space<vmem>>, %arg9: memref<1x128xf32, #tpu.memory_space<vmem>>, %arg10: memref<128x128xf32, #tpu.memory_space<vmem>>) attributes {dimension_semantics = [#tpu.dimension_semantics<parallel>], iteration_bounds = array<i64: 1>, scalar_prefetch = 0 : i64, scratch_operands = 0 : i64, tpu.core_type = #tpu.core_type<tc>, window_params = [{transform_indices = @transform_0, window_bounds = array<i64: 128, 896>}, {pipeline_mode = #tpu.pipeline_mode<synchronous>, transform_indices = @transform_1, window_bounds = array<i64: 896, 256>}, {pipeline_mode = #tpu.pipeline_mode<synchronous>, transform_indices = @transform_2, window_bounds = array<i64: 1, 256>}, {pipeline_mode = #tpu.pipeline_mode<synchronous>, transform_indices = @transform_3, window_bounds = array<i64: 256, 128>}, {pipeline_mode = #tpu.pipeline_mode<synchronous>, transform_indices = @transform_4, window_bounds = array<i64: 1, 128>}, {pipeline_mode = #tpu.pipeline_mode<synchronous>, transform_indices = @transform_5, window_bounds = array<i64: 128, 128>}, {pipeline_mode = #tpu.pipeline_mode<synchronous>, transform_indices = @transform_6, window_bounds = array<i64: 1, 128>}, {pipeline_mode = #tpu.pipeline_mode<synchronous>, transform_indices = @transform_7, window_bounds = array<i64: 128, 128>}, {pipeline_mode = #tpu.pipeline_mode<synchronous>, transform_indices = @transform_8, window_bounds = array<i64: 1, 128>}, {transform_indices = @transform_9, window_bounds = array<i64: 128, 128>}]} {
    %c0 = arith.constant 0 : index
    %c0_0 = arith.constant 0 : index
    %0 = vector.load %arg1[%c0, %c0_0] : memref<128x896xbf16, #tpu.memory_space<vmem>>, vector<128x896xbf16>
    %c0_1 = arith.constant 0 : index
    %c0_2 = arith.constant 0 : index
    %1 = vector.load %arg2[%c0_1, %c0_2] : memref<896x256xbf16, #tpu.memory_space<vmem>>, vector<896x256xbf16>
    %cst = arith.constant dense<0.000000e+00> : vector<128x256xf32>
    %2 = tpu.matmul %0, %1, %cst {dimension_numbers = #tpu.dot_dimension_numbers<[1], [0], [0], [1], [0, 0, 1, 1], [], []>} : vector<128x896xbf16>, vector<896x256xbf16>, vector<128x256xf32> -> vector<128x256xf32>
    %c0_3 = arith.constant 0 : index
    %c0_4 = arith.constant 0 : index
    %3 = vector.load %arg3[%c0_3, %c0_4] : memref<1x256xf32, #tpu.memory_space<vmem>>, vector<1x256xf32>
    %4 = vector.broadcast %3 : vector<1x256xf32> to vector<128x256xf32>
    %5 = arith.addf %2, %4 : vector<128x256xf32>
    %cst_5 = arith.constant 0.000000e+00 : f32
    %6 = vector.broadcast %cst_5 : f32 to vector<128x256xf32>
    %7 = arith.maximumf %5, %6 : vector<128x256xf32>
    %8 = arith.truncf %7 : vector<128x256xf32> to vector<128x256xbf16>
    %c0_6 = arith.constant 0 : index
    %c0_7 = arith.constant 0 : index
    %9 = vector.load %arg4[%c0_6, %c0_7] : memref<256x128xbf16, #tpu.memory_space<vmem>>, vector<256x128xbf16>
    %cst_8 = arith.constant dense<0.000000e+00> : vector<128x128xf32>
    %10 = tpu.matmul %8, %9, %cst_8 {dimension_numbers = #tpu.dot_dimension_numbers<[1], [0], [0], [1], [0, 0, 1, 1], [], []>} : vector<128x256xbf16>, vector<256x128xbf16>, vector<128x128xf32> -> vector<128x128xf32>
    %c0_9 = arith.constant 0 : index
    %c0_10 = arith.constant 0 : index
    %11 = vector.load %arg5[%c0_9, %c0_10] : memref<1x128xf32, #tpu.memory_space<vmem>>, vector<1x128xf32>
    %12 = vector.broadcast %11 : vector<1x128xf32> to vector<128x128xf32>
    %13 = arith.addf %10, %12 : vector<128x128xf32>
    %cst_11 = arith.constant 0.000000e+00 : f32
    %14 = vector.broadcast %cst_11 : f32 to vector<128x128xf32>
    %15 = arith.maximumf %13, %14 : vector<128x128xf32>
    %16 = arith.truncf %15 : vector<128x128xf32> to vector<128x128xbf16>
    %c0_12 = arith.constant 0 : index
    %c0_13 = arith.constant 0 : index
    %17 = vector.load %arg6[%c0_12, %c0_13] : memref<128x128xbf16, #tpu.memory_space<vmem>>, vector<128x128xbf16>
    %cst_14 = arith.constant dense<0.000000e+00> : vector<128x128xf32>
    %18 = tpu.matmul %16, %17, %cst_14 {dimension_numbers = #tpu.dot_dimension_numbers<[1], [0], [0], [1], [0, 0, 1, 1], [], []>} : vector<128x128xbf16>, vector<128x128xbf16>, vector<128x128xf32> -> vector<128x128xf32>
    %c0_15 = arith.constant 0 : index
    %c0_16 = arith.constant 0 : index
    %19 = vector.load %arg7[%c0_15, %c0_16] : memref<1x128xf32, #tpu.memory_space<vmem>>, vector<1x128xf32>
    %20 = vector.broadcast %19 : vector<1x128xf32> to vector<128x128xf32>
    %21 = arith.addf %18, %20 : vector<128x128xf32>
    %cst_17 = arith.constant 0.000000e+00 : f32
    %22 = vector.broadcast %cst_17 : f32 to vector<128x128xf32>
    %23 = arith.maximumf %21, %22 : vector<128x128xf32>
    %24 = arith.truncf %23 : vector<128x128xf32> to vector<128x128xbf16>
    %c0_18 = arith.constant 0 : index
    %c0_19 = arith.constant 0 : index
    %25 = vector.load %arg8[%c0_18, %c0_19] : memref<128x128xbf16, #tpu.memory_space<vmem>>, vector<128x128xbf16>
    %cst_20 = arith.constant dense<0.000000e+00> : vector<128x128xf32>
    %26 = tpu.matmul %24, %25, %cst_20 {dimension_numbers = #tpu.dot_dimension_numbers<[1], [0], [0], [1], [0, 0, 1, 1], [], []>} : vector<128x128xbf16>, vector<128x128xbf16>, vector<128x128xf32> -> vector<128x128xf32>
    %c0_21 = arith.constant 0 : index
    %c0_22 = arith.constant 0 : index
    %27 = vector.load %arg9[%c0_21, %c0_22] : memref<1x128xf32, #tpu.memory_space<vmem>>, vector<1x128xf32>
    %28 = vector.broadcast %27 : vector<1x128xf32> to vector<128x128xf32>
    %29 = arith.addf %26, %28 : vector<128x128xf32>
    %c0_23 = arith.constant 0 : index
    %c0_24 = arith.constant 0 : index
    %30 = vector.load %arg10[%c0_23, %c0_24] : memref<128x128xf32, #tpu.memory_space<vmem>>, vector<128x128xf32>
    tpu.vector_store %arg10[%c0_23, %c0_24], %29 {strides = array<i32>} : memref<128x128xf32, #tpu.memory_space<vmem>>, vector<128x128xf32>,
    return
  }
  func.func @transform_0(%arg0: i32) -> (i32, i32) {
    %c0_i32 = arith.constant 0 : i32
    %c0_i32_0 = arith.constant 0 : i32
    return %arg0, %c0_i32 : i32, i32
  }
  func.func @transform_1(%arg0: i32) -> (i32, i32) {
    %c0_i32 = arith.constant 0 : i32
    %c0_i32_0 = arith.constant 0 : i32
    %c0_i32_1 = arith.constant 0 : i32
    return %c0_i32, %c0_i32_0 : i32, i32
  }
  func.func @transform_2(%arg0: i32) -> (i32, i32) {
    %c0_i32 = arith.constant 0 : i32
    %c0_i32_0 = arith.constant 0 : i32
    %c0_i32_1 = arith.constant 0 : i32
    return %c0_i32, %c0_i32_0 : i32, i32
  }
  func.func @transform_3(%arg0: i32) -> (i32, i32) {
    %c0_i32 = arith.constant 0 : i32
    %c0_i32_0 = arith.constant 0 : i32
    %c0_i32_1 = arith.constant 0 : i32
    return %c0_i32, %c0_i32_0 : i32, i32
  }
  func.func @transform_4(%arg0: i32) -> (i32, i32) {
    %c0_i32 = arith.constant 0 : i32
    %c0_i32_0 = arith.constant 0 : i32
    %c0_i32_1 = arith.constant 0 : i32
    return %c0_i32, %c0_i32_0 : i32, i32
  }
  func.func @transform_5(%arg0: i32) -> (i32, i32) {
    %c0_i32 = arith.constant 0 : i32
    %c0_i32_0 = arith.constant 0 : i32
    %c0_i32_1 = arith.constant 0 : i32
    return %c0_i32, %c0_i32_0 : i32, i32
  }
  func.func @transform_6(%arg0: i32) -> (i32, i32) {
    %c0_i32 = arith.constant 0 : i32
    %c0_i32_0 = arith.constant 0 : i32
    %c0_i32_1 = arith.constant 0 : i32
    return %c0_i32, %c0_i32_0 : i32, i32
  }
  func.func @transform_7(%arg0: i32) -> (i32, i32) {
    %c0_i32 = arith.constant 0 : i32
    %c0_i32_0 = arith.constant 0 : i32
    %c0_i32_1 = arith.constant 0 : i32
    return %c0_i32, %c0_i32_0 : i32, i32
  }
  func.func @transform_8(%arg0: i32) -> (i32, i32) {
    %c0_i32 = arith.constant 0 : i32
    %c0_i32_0 = arith.constant 0 : i32
    %c0_i32_1 = arith.constant 0 : i32
    return %c0_i32, %c0_i32_0 : i32, i32
  }
  func.func @transform_9(%arg0: i32) -> (i32, i32) {
    %c0_i32 = arith.constant 0 : i32
    %c0_i32_0 = arith.constant 0 : i32
    return %arg0, %c0_i32 : i32, i32
  }
}

</mosaic_0001>

<bundles_post_ra>
// kernel: tpu_custom_call.1
= control target key start
LH: loop header
LB: loop body
LE: loop exit
PB: predicated region body
PF: predicated region fallthrough
CT: control target
= control target key end

     0   :  { %14 = vsyncpa [#allocation3], 0  ;;  %s3387_s0 = inlined_call_operand.hbm [shape: bf16[128,896], index: 0, kind: input, shape index: {}]   ;;  %s3388_s1 = inlined_call_operand.hbm [shape: bf16[896,256], index: 1, kind: input, shape index: {}]   ;;  %s3389_s2 = inlined_call_operand.vmem [shape: f32[1,256], index: 2, kind: input, shape index: {}]   ;;  %s3390_s3 = inlined_call_operand.hbm [shape: bf16[256,128], index: 3, kind: input, shape index: {}]   ;;  %s3391_s4 = inlined_call_operand.vmem [shape: f32[1,128], index: 4, kind: input, shape index: {}]   ;;  %s3392_s5 = inlined_call_operand.hbm [shape: bf16[128,128], index: 5, kind: input, shape index: {}]   ;;  %s3393_s6 = inlined_call_operand.vmem [shape: f32[1,128], index: 6, kind: input, shape index: {}]   ;;  %s3394_s7 = inlined_call_operand.hbm [shape: bf16[128,128], index: 7, kind: input, shape index: {}]   ;;  %s3395_s8 = inlined_call_operand.vmem [shape: f32[1,128], index: 8, kind: input, shape index: {}]   ;;  %s3396_s9 = inlined_call_operand.hbm [shape: f32[128,128], index: 9, kind: output, shape index: {}]  }
   0x1   :  { %15 = vsyncpa [#allocation6], 0 }
   0x2   :  { %16 = vsyncpa [#allocation9], 0 }
   0x3   :  { %17 = vsyncpa [#allocation4], 0  ;;  %s3073_s30 = smov [#allocation5]  }
   0x4   :  { %s35_s10 = sshll.u32 %s3073_s30, 4  ;;  %s36_s10 = int_to_ptr.vmem [resolvable:$true] %s35_s10 }
   0x5   :  { %s2953_s11 = scalar_lea.vmem %s36_s10, 14336  ;;  %p2958_p1 = scmp.lt.s32.totalorder %s36_s10, %s36_s10 }
   0x6   :  { %p2954_p0 = scmp.ne.s32.totalorder %s36_s10, %s2953_s11  ;;  %p2959_p2 = scmp.lt.s32.totalorder %s2953_s11, %s2953_s11 }
   0x8   :  { %p2960_p3 = por %p2959_p2, %p2958_p1 }
   0xa   :  { %p2961_p4 = pnand %p2960_p3, %p2954_p0 }
   0xc   :  { %2964 = shalt.err (!%p2961_p4)
}
   0xd   :  { %s3074_s12 = smov 128   ;;  %s3075_s13 = smov 8  }
   0xe   :  { %41 = dma.hbm_to_vmem [thread:$0]  %s3388_s1, 14336, %s36_s10, [#allocation6], %s3074_s12, %s3074_s12, %s3075_s13  }
   0xf   :  { %s3076_s16 = smov [#allocation8]   ;;  %s3077_s18 = smov [#allocation2]  }
  0x10   :  { %s63_s17 = sshll.u32 %s3076_s16, 4  ;;  %s23_s19 = sshll.u32 %s3077_s18, 4  ;;  %s64_s17 = int_to_ptr.vmem [resolvable:$true] %s63_s17  ;;  %s24_s19 = int_to_ptr.vmem [resolvable:$true] %s23_s19 }
  0x11   :  { %s2973_s20 = scalar_lea.vmem %s64_s17, 1024  ;;  %p2978_p6 = scmp.lt.s32.totalorder %s64_s17, %s64_s17 }
  0x12   :  { %p2974_p5 = scmp.ne.s32.totalorder %s64_s17, %s2973_s20  ;;  %p2979_p7 = scmp.lt.s32.totalorder %s2973_s20, %s2973_s20 }
  0x14   :  { %p2980_p8 = por %p2979_p7, %p2978_p6 }
  0x16   :  { %p2981_p9 = pnand %p2980_p8, %p2974_p5 }
  0x18   :  { %2984 = shalt.err (!%p2981_p9)
}
  0x19   :  { %s3078_s21 = smov 64   ;;  %s3079_s22 = smov 4  }
  0x1a   :  { %69 = dma.hbm_to_vmem [thread:$0]  %s3392_s5, 1024, %s64_s17, [#allocation9], %s3078_s21, %s3078_s21, %s3079_s22  }
  0x1b   :  { %s2993_s1 = scalar_lea.vmem %s24_s19, 7168  ;;  %p2998_p11 = scmp.lt.s32.totalorder %s24_s19, %s24_s19 }
  0x1c   :  { %p2994_p10 = scmp.ne.s32.totalorder %s24_s19, %s2993_s1  ;;  %p2999_p12 = scmp.lt.s32.totalorder %s2993_s1, %s2993_s1 }
  0x1e   :  { %p3000_p13 = por %p2999_p12, %p2998_p11 }
  0x20   :  { %p3001_p0 = pnand %p3000_p13, %p2994_p10 }
  0x22   :  { %3004 = shalt.err (!%p3001_p0)
}
  0x23   :  { %s3080_s25 = smov 448   ;;  %s3081_s26 = smov 28  }
  0x24   :  { %29 = dma.hbm_to_vmem [thread:$0]  %s3387_s0, 7168, %s24_s19, [#allocation3], %s3080_s25, %s3080_s25, %s3081_s26  }
  0x25   :  { %s3082_s29 = smov [#allocation7]   ;;  %s3083_s10 = smov [#allocation10]  }
  0x26   :  { %s49_s30 = sshll.u32 %s3082_s29, 4  ;;  %s77_s11 = sshll.u32 %s3083_s10, 4  ;;  %s50_s30 = int_to_ptr.vmem [resolvable:$true] %s49_s30  ;;  %s78_s11 = int_to_ptr.vmem [resolvable:$true] %s77_s11 }
  0x27   :  { %s3013_s5 = scalar_lea.vmem %s50_s30, 2048  ;;  %p3018_p2 = scmp.lt.s32.totalorder %s50_s30, %s50_s30 }
  0x28   :  { %p3014_p1 = scmp.ne.s32.totalorder %s50_s30, %s3013_s5  ;;  %p3019_p3 = scmp.lt.s32.totalorder %s3013_s5, %s3013_s5 }
  0x2a   :  { %p3020_p4 = por %p3019_p3, %p3018_p2 }
  0x2c   :  { %p3021_p5 = pnand %p3020_p4, %p3014_p1 }
  0x2e   :  { %3024 = shalt.err (!%p3021_p5)
}
  0x2f   :  { %55 = dma.hbm_to_vmem [thread:$0]  %s3390_s3, 2048, %s50_s30, [#allocation6], %s3078_s21, %s3078_s21, %s3079_s22  }
  0x30   :  { %s3033_s0 = scalar_lea.vmem %s78_s11, 1024  ;;  %p3038_p7 = scmp.lt.s32.totalorder %s78_s11, %s78_s11 }
  0x31   :  { %p3034_p6 = scmp.ne.s32.totalorder %s78_s11, %s3033_s0  ;;  %p3039_p8 = scmp.lt.s32.totalorder %s3033_s0, %s3033_s0 }
  0x33   :  { %p3040_p9 = por %p3039_p8, %p3038_p7 }
  0x35   :  { %p3041_p10 = pnand %p3040_p9, %p3034_p6 }
  0x37   :  { %3044 = shalt.err (!%p3041_p10)
}
  0x38   :  { %83 = dma.hbm_to_vmem [thread:$0]  %s3394_s7, 1024, %s78_s11, [#allocation9], %s3078_s21, %s3078_s21, %s3079_s22  }
  0x39   :  { %3065 = dma.done.wait [#allocation3], 7168  }
  0x3a   :  { %3066 = vsyncadd [#allocation3], 4294960128 }
  0x3b   :  { %3067 = dma.done.wait [#allocation6], 16384  }
  0x3c   :  { %3068 = vsyncadd [#allocation6], 4294950912 }
  0x3d   :  { %3069 = dma.done.wait [#allocation9], 2048  }
  0x3e   :  { %3070 = vsyncadd [#allocation9], 4294965248  ;;  %v2665_v0 = vld [vmem:[#allocation5 + $0x74] ss:$8 sps:$4 sm:$0xff]   ;;  %v2669_v2 = vld [vmem:[#allocation5 + $0x70] ss:$8 sps:$4 sm:$0xff]  }
  0x3f   :  { %v2667_v1 = vld [vmem:[#allocation5 + $0x174] ss:$8 sps:$4 sm:$0xff]   ;;  %1138 = vmatprep.subr.bf16.mxu0 %v2665_v0  ;;  %v2670_v3 = vld [vmem:[#allocation5 + $0x170] ss:$8 sps:$4 sm:$0xff]   ;;  %v2671_v4 = vld [vmem:[#allocation5 + $0x64] ss:$8 sps:$4 sm:$0xff]  }
  0x40   :  { %1251 = vmatprep.subr.bf16.mxu1 %v2667_v1  ;;  %1139 = vmatpush1.bf16.msra.mxu0 %v2669_v2  ;;  %v2673_v5 = vld [vmem:[#allocation5 + $0x164] ss:$8 sps:$4 sm:$0xff]   ;;  %v2675_v6 = vld [vmem:[#allocation5 + $0x60] ss:$8 sps:$4 sm:$0xff]   ;;  %v2677_v8 = vld [vmem:[#allocation5 + $0x54] ss:$8 sps:$4 sm:$0xff]  }
  0x41   :  { %1252 = vmatpush1.bf16.msra.mxu1 %v2670_v3  ;;  %1140 = vmatprep.subr.bf16.mxu0 %v2671_v4  ;;  %v2676_v7 = vld [vmem:[#allocation5 + $0x160] ss:$8 sps:$4 sm:$0xff]   ;;  %v2679_v9 = vld [vmem:[#allocation5 + $0x154] ss:$8 sps:$4 sm:$0xff]   ;;  %v2681_v10 = vld [vmem:[#allocation5 + $0x50] ss:$8 sps:$4 sm:$0xff]  }
  0x42   :  { %1253 = vmatprep.subr.bf16.mxu1 %v2673_v5  ;;  %v2682_v11 = vld [vmem:[#allocation5 + $0x150] ss:$8 sps:$4 sm:$0xff]   ;;  %v2683_v12 = vld [vmem:[#allocation5 + $0x44] ss:$8 sps:$4 sm:$0xff]   ;;  %v2687_v14 = vld [vmem:[#allocation5 + $0x40] ss:$8 sps:$4 sm:$0xff]  }
  0x43   :  { %v2685_v13 = vld [vmem:[#allocation5 + $0x144] ss:$8 sps:$4 sm:$0xff]   ;;  %v2688_v15 = vld [vmem:[#allocation5 + $0x140] ss:$8 sps:$4 sm:$0xff]   ;;  %v2689_v16 = vld [vmem:[#allocation5 + $0x34] ss:$8 sps:$4 sm:$0xff]  }
  0x44   :  { %1141 = vmatpush1.bf16.msra.mxu0 %v2675_v6  ;;  %v2691_v17 = vld [vmem:[#allocation5 + $0x134] ss:$8 sps:$4 sm:$0xff]   ;;  %v2693_v18 = vld [vmem:[#allocation5 + $0x30] ss:$8 sps:$4 sm:$0xff]   ;;  %v2695_v20 = vld [vmem:[#allocation5 + $0x24] ss:$8 sps:$4 sm:$0xff]  }
  0x45   :  { %1254 = vmatpush1.bf16.msra.mxu1 %v2676_v7  ;;  %1142 = vmatprep.subr.bf16.mxu0 %v2677_v8  ;;  %v2694_v19 = vld [vmem:[#allocation5 + $0x130] ss:$8 sps:$4 sm:$0xff]   ;;  %v2697_v21 = vld [vmem:[#allocation5 + $0x124] ss:$8 sps:$4 sm:$0xff]   ;;  %v2699_v22 = vld [vmem:[#allocation5 + $0x20] ss:$8 sps:$4 sm:$0xff]  }
  0x46   :  { %1255 = vmatprep.subr.bf16.mxu1 %v2679_v9  ;;  %v2700_v23 = vld [vmem:[#allocation5 + $0x120] ss:$8 sps:$4 sm:$0xff]   ;;  %v2701_v24 = vld [vmem:[#allocation5 + $0x14] ss:$8 sps:$4 sm:$0xff]   ;;  %v2705_v26 = vld [vmem:[#allocation5 + $0x10] ss:$8 sps:$4 sm:$0xff]  }
  0x47   :  { %v2703_v25 = vld [vmem:[#allocation5 + $0x114] ss:$8 sps:$4 sm:$0xff]   ;;  %v2706_v27 = vld [vmem:[#allocation5 + $0x110] ss:$8 sps:$4 sm:$0xff]   ;;  %v2707_v28 = vld [vmem:[#allocation5 + $0x4] ss:$8 sps:$4 sm:$0xff]  }
  0x48   :  { %1143 = vmatpush1.bf16.msra.mxu0 %v2681_v10  ;;  %v2709_v29 = vld [vmem:[#allocation5 + $0x104] ss:$8 sps:$4 sm:$0xff]   ;;  %v2711_v30 = vld [vmem:[#allocation5] ss:$8 sps:$4 sm:$0xff]   ;;  %v2713_v32 = vld [vmem:[#allocation5 + $0xf4] ss:$8 sps:$4 sm:$0xff]  }
  0x49   :  { %1256 = vmatpush1.bf16.msra.mxu1 %v2682_v11  ;;  %1144 = vmatprep.subr.bf16.mxu0 %v2683_v12  ;;  %v2712_v31 = vld [vmem:[#allocation5 + $0x100] ss:$8 sps:$4 sm:$0xff]   ;;  %v2715_v33 = vld [vmem:[#allocation5 + $0x1f4] ss:$8 sps:$4 sm:$0xff]   ;;  %v2717_v34 = vld [vmem:[#allocation5 + $0xf0] ss:$8 sps:$4 sm:$0xff]  }
  0x4a   :  { %1257 = vmatprep.subr.bf16.mxu1 %v2685_v13  ;;  %v2718_v35 = vld [vmem:[#allocation5 + $0x1f0] ss:$8 sps:$4 sm:$0xff]   ;;  %v2719_v36 = vld [vmem:[#allocation5 + $0xe4] ss:$8 sps:$4 sm:$0xff]   ;;  %v2723_v38 = vld [vmem:[#allocation5 + $0xe0] ss:$8 sps:$4 sm:$0xff]  }
  0x4b   :  { %v2721_v37 = vld [vmem:[#allocation5 + $0x1e4] ss:$8 sps:$4 sm:$0xff]   ;;  %v2724_v39 = vld [vmem:[#allocation5 + $0x1e0] ss:$8 sps:$4 sm:$0xff]   ;;  %v2725_v40 = vld [vmem:[#allocation5 + $0xd4] ss:$8 sps:$4 sm:$0xff]  }
  0x4c   :  { %1145 = vmatpush1.bf16.msra.mxu0 %v2687_v14  ;;  %v2727_v41 = vld [vmem:[#allocation5 + $0x1d4] ss:$8 sps:$4 sm:$0xff]   ;;  %v2729_v42 = vld [vmem:[#allocation5 + $0xd0] ss:$8 sps:$4 sm:$0xff]   ;;  %v2731_v44 = vld [vmem:[#allocation5 + $0xc4] ss:$8 sps:$4 sm:$0xff]  }
  0x4d   :  { %1258 = vmatpush1.bf16.msra.mxu1 %v2688_v15  ;;  %1146 = vmatprep.subr.bf16.mxu0 %v2689_v16  ;;  %v2730_v43 = vld [vmem:[#allocation5 + $0x1d0] ss:$8 sps:$4 sm:$0xff]   ;;  %v2733_v45 = vld [vmem:[#allocation5 + $0x1c4] ss:$8 sps:$4 sm:$0xff]   ;;  %v2735_v46 = vld [vmem:[#allocation5 + $0xc0] ss:$8 sps:$4 sm:$0xff]  }
  0x4e   :  { %1259 = vmatprep.subr.bf16.mxu1 %v2691_v17  ;;  %v2736_v47 = vld [vmem:[#allocation5 + $0x1c0] ss:$8 sps:$4 sm:$0xff]   ;;  %v2737_v48 = vld [vmem:[#allocation5 + $0xb4] ss:$8 sps:$4 sm:$0xff]   ;;  %v2741_v52 = vld [vmem:[#allocation5 + $0xb0] ss:$8 sps:$4 sm:$0xff]  }
  0x4f   :  { %v2763_v49 = vld [vmem:[#allocation2 + $0x4] ss:$28 sps:$4 sm:$0xff]   ;;  %v2739_v50 = vld [vmem:[#allocation5 + $0x1b4] ss:$8 sps:$4 sm:$0xff]   ;;  %v2766_v51 = vld [vmem:[#allocation2 + $0xc] ss:$28 sps:$4 sm:$0xff]  }
  0x50   :  { %1147 = vmatpush1.bf16.msra.mxu0 %v2693_v18  ;;  %1170 = vmatprep.mubr.bf16.mxu0 %v2763_v49  ;;  %v2742_v53 = vld [vmem:[#allocation5 + $0x1b0] ss:$8 sps:$4 sm:$0xff]   ;;  %v2743_v54 = vld [vmem:[#allocation5 + $0xa4] ss:$8 sps:$4 sm:$0xff]   ;;  %v2747_v56 = vld [vmem:[#allocation5 + $0xa0] ss:$8 sps:$4 sm:$0xff]  }
  0x51   :  { %1260 = vmatpush1.bf16.msra.mxu1 %v2694_v19  ;;  %1148 = vmatprep.subr.bf16.mxu0 %v2695_v20  ;;  %v2745_v55 = vld [vmem:[#allocation5 + $0x1a4] ss:$8 sps:$4 sm:$0xff]   ;;  %v2748_v57 = vld [vmem:[#allocation5 + $0x1a0] ss:$8 sps:$4 sm:$0xff]   ;;  %v2749_v58 = vld [vmem:[#allocation5 + $0x94] ss:$8 sps:$4 sm:$0xff]  }
  0x52   :  { %1261 = vmatprep.subr.bf16.mxu1 %v2697_v21  ;;  %1283 = vmatprep.mubr.bf16.mxu1 %v2766_v51  ;;  %v2751_v59 = vld [vmem:[#allocation5 + $0x194] ss:$8 sps:$4 sm:$0xff]   ;;  %v2753_v60 = vld [vmem:[#allocation5 + $0x90] ss:$8 sps:$4 sm:$0xff]   ;;  %v2755_v62 = vld [vmem:[#allocation5 + $0x84] ss:$8 sps:$4 sm:$0xff]  }
  0x53   :  { %v2754_v61 = vld [vmem:[#allocation5 + $0x190] ss:$8 sps:$4 sm:$0xff]   ;;  %v2757_v63 = vld [vmem:[#allocation5 + $0x184] ss:$8 sps:$4 sm:$0xff]   ;;  %v2759_v0 = vld [vmem:[#allocation5 + $0x80] ss:$8 sps:$4 sm:$0xff]  }
  0x54   :  { %1149 = vmatpush1.bf16.msra.mxu0 %v2699_v22  ;;  %v2760_v1 = vld [vmem:[#allocation5 + $0x180] ss:$8 sps:$4 sm:$0xff]   ;;  %v2769_v2 = vld [vmem:[#allocation5 + $0x274] ss:$8 sps:$4 sm:$0xff]   ;;  %v2767_v6 = vld [vmem:[#allocation5 + $0x270] ss:$8 sps:$4 sm:$0xff]  }
  0x55   :  { %1262 = vmatpush1.bf16.msra.mxu1 %v2700_v23  ;;  %1150 = vmatprep.subr.bf16.mxu0 %v2701_v24  ;;  %v2772_v3 = vld [vmem:[#allocation5 + $0x374] ss:$8 sps:$4 sm:$0xff]   ;;  %v2764_v5 = vld [vmem:[#allocation2 + $0x8] ss:$28 sps:$4 sm:$0xff]   ;;  %v2770_v7 = vld [vmem:[#allocation5 + $0x370] ss:$8 sps:$4 sm:$0xff]  }
  0x56   :  { %1263 = vmatprep.subr.bf16.mxu1 %v2703_v25  ;;  %v2761_v4 = vld [vmem:[#allocation2] ss:$28 sps:$4 sm:$0xff]   ;;  %v2775_v8 = vld [vmem:[#allocation5 + $0x264] ss:$8 sps:$4 sm:$0xff]   ;;  %v2780_v16 = vld [vmem:[#allocation2 + $0x38] ss:$28 sps:$4 sm:$0xff]  }
  0x57   :  { %v2776_v9 = vld [vmem:[#allocation2 + $0x3c] ss:$28 sps:$4 sm:$0xff]   ;;  %v2778_v10 = vld [vmem:[#allocation2 + $0x44] ss:$28 sps:$4 sm:$0xff]   ;;  %v2791_v20 = vld [vmem:[#allocation2 + $0x74] ss:$28 sps:$4 sm:$0xff]  }
  0x58   :  { %1151 = vmatpush1.bf16.msra.mxu0 %v2705_v26  ;;  %v2787_v11 = vld [vmem:[#allocation5 + $0x364] ss:$8 sps:$4 sm:$0xff]   ;;  %v2773_v12 = vld [vmem:[#allocation5 + $0x260] ss:$8 sps:$4 sm:$0xff]   ;;  %v2784_v13 = vld [vmem:[#allocation5 + $0x254] ss:$8 sps:$4 sm:$0xff]  }
  0x59   :  { %1264 = vmatpush1.bf16.msra.mxu1 %v2706_v27  ;;  %1152 = vmatprep.subr.bf16.mxu0 %v2707_v28  ;;  %v2785_v14 = vld [vmem:[#allocation5 + $0x360] ss:$8 sps:$4 sm:$0xff]   ;;  %v2802_v15 = vld [vmem:[#allocation5 + $0x354] ss:$8 sps:$4 sm:$0xff]   ;;  %v2782_v18 = vld [vmem:[#allocation5 + $0x250] ss:$8 sps:$4 sm:$0xff]  }
  0x5a   :  { %1265 = vmatprep.subr.bf16.mxu1 %v2709_v29  ;;  %v2781_v17 = vld [vmem:[#allocation2 + $0x40] ss:$28 sps:$4 sm:$0xff]   ;;  %v2790_v19 = vld [vmem:[#allocation5 + $0x244] ss:$8 sps:$4 sm:$0xff]   ;;  %v2800_v22 = vld [vmem:[#allocation5 + $0x350] ss:$8 sps:$4 sm:$0xff]  }
  0x5b   :  { %v2793_v21 = vld [vmem:[#allocation2 + $0x7c] ss:$28 sps:$4 sm:$0xff]   ;;  %v2817_v23 = vld [vmem:[#allocation5 + $0x344] ss:$8 sps:$4 sm:$0xff]   ;;  %v2788_v24 = vld [vmem:[#allocation5 + $0x240] ss:$8 sps:$4 sm:$0xff]  }
  0x5c   :  { %1153 = vmatpush1.bf16.msra.mxu0 %v2711_v30  ;;  %v2795_v25 = vld [vmem:[#allocation2 + $0x70] ss:$28 sps:$4 sm:$0xff]   ;;  %v2799_v26 = vld [vmem:[#allocation5 + $0x234] ss:$8 sps:$4 sm:$0xff]   ;;  %v2815_v28 = vld [vmem:[#allocation5 + $0x340] ss:$8 sps:$4 sm:$0xff]  }
  0x5d   :  { %1266 = vmatpush1.bf16.msra.mxu1 %v2712_v31  ;;  %1154 = vmatprep.subr.bf16.mxu0 %v2713_v32  ;;  %v2796_v27 = vld [vmem:[#allocation2 + $0x78] ss:$28 sps:$4 sm:$0xff]   ;;  %v2805_v30 = vld [vmem:[#allocation5 + $0x224] ss:$8 sps:$4 sm:$0xff]  }
  0x5e   :  { %1267 = vmatprep.subr.bf16.mxu1 %v2715_v33  ;;  %v2797_v29 = vld [vmem:[#allocation5 + $0x230] ss:$8 sps:$4 sm:$0xff]   ;;  %v2806_v31 = vld [vmem:[#allocation2 + $0xac] ss:$28 sps:$4 sm:$0xff]   ;;  %v2832_v33 = vld [vmem:[#allocation5 + $0x334] ss:$8 sps:$4 sm:$0xff]  }
  0x5f   :  { %v2808_v32 = vld [vmem:[#allocation2 + $0xb4] ss:$28 sps:$4 sm:$0xff]   ;;  %v2826_v49 = vld [vmem:[#allocation2 + $0xe8] ss:$28 sps:$4 sm:$0xff]  }
  0x60   :  { %1155 = vmatpush2.bf16.msra.mxu0 %v2717_v34  ;;  %v2830_v34 = vld [vmem:[#allocation5 + $0x330] ss:$8 sps:$4 sm:$0xff]  }
  0x61   :  { %1268 = vmatpush2.bf16.msra.mxu1 %v2718_v35  ;;  %1156 = vmatprep.subr.bf16.mxu0 %v2719_v36  ;;  %v2803_v35 = vld [vmem:[#allocation5 + $0x220] ss:$8 sps:$4 sm:$0xff]   ;;  %v2847_v36 = vld [vmem:[#allocation5 + $0x324] ss:$8 sps:$4 sm:$0xff]   ;;  %v2827_v51 = vld [vmem:[#allocation5 + $0x2f0] ss:$8 sps:$4 sm:$0xff]  }
  0x62   :  { %1269 = vmatprep.subr.bf16.mxu1 %v2721_v37  ;;  %v2814_v37 = vld [vmem:[#allocation5 + $0x214] ss:$8 sps:$4 sm:$0xff]  }
  0x64   :  { %1157 = vmatpush2.bf16.msra.mxu0 %v2723_v38  ;;  %v2810_v38 = vld [vmem:[#allocation2 + $0xa8] ss:$28 sps:$4 sm:$0xff]  }
  0x65   :  { %1270 = vmatpush2.bf16.msra.mxu1 %v2724_v39  ;;  %1158 = vmatprep.subr.bf16.mxu0 %v2725_v40  ;;  %v2811_v39 = vld [vmem:[#allocation2 + $0xb0] ss:$28 sps:$4 sm:$0xff]  }
  0x66   :  { %1271 = vmatprep.subr.bf16.mxu1 %v2727_v41  ;;  %v2812_v40 = vld [vmem:[#allocation5 + $0x210] ss:$8 sps:$4 sm:$0xff]   ;;  %v2820_v41 = vld [vmem:[#allocation5 + $0x204] ss:$8 sps:$4 sm:$0xff]  }
  0x68   :  { %1159 = vmatpush2.bf16.msra.mxu0 %v2729_v42  ;;  %v2821_v42 = vld [vmem:[#allocation2 + $0xe4] ss:$28 sps:$4 sm:$0xff]  }
  0x69   :  { %1272 = vmatpush2.bf16.msra.mxu1 %v2730_v43  ;;  %1160 = vmatprep.subr.bf16.mxu0 %v2731_v44  ;;  %v2823_v43 = vld [vmem:[#allocation2 + $0xec] ss:$28 sps:$4 sm:$0xff]  }
  0x6a   :  { %1273 = vmatprep.subr.bf16.mxu1 %v2733_v45  ;;  %v2845_v44 = vld [vmem:[#allocation5 + $0x320] ss:$8 sps:$4 sm:$0xff]   ;;  %v2862_v45 = vld [vmem:[#allocation5 + $0x314] ss:$8 sps:$4 sm:$0xff]  }
  0x6c   :  { %1161 = vmatpush2.bf16.msra.mxu0 %v2735_v46  ;;  %v2818_v46 = vld [vmem:[#allocation5 + $0x200] ss:$8 sps:$4 sm:$0xff]  }
  0x6d   :  { %1274 = vmatpush2.bf16.msra.mxu1 %v2736_v47  ;;  %1162 = vmatprep.subr.bf16.mxu0 %v2737_v48  ;;  %v2825_v47 = vld [vmem:[#allocation2 + $0xe0] ss:$28 sps:$4 sm:$0xff]  }
  0x6e   :  { %1275 = vmatprep.subr.bf16.mxu1 %v2739_v50  ;;  %v2829_v48 = vld [vmem:[#allocation5 + $0x2f4] ss:$8 sps:$4 sm:$0xff]   ;;  %v2860_v50 = vld [vmem:[#allocation5 + $0x310] ss:$8 sps:$4 sm:$0xff]  }
  0x70   :  { %1163 = vmatpush2.bf16.msra.mxu0 %v2741_v52  ;;  %v2835_v52 = vld [vmem:[#allocation5 + $0x2e4] ss:$8 sps:$4 sm:$0xff]  }
  0x71   :  { %1276 = vmatpush2.bf16.msra.mxu1 %v2742_v53  ;;  %1164 = vmatprep.subr.bf16.mxu0 %v2743_v54  ;;  %v2836_v53 = vld [vmem:[#allocation2 + $0x11c] ss:$28 sps:$4 sm:$0xff]   ;;  %v2838_v54 = vld [vmem:[#allocation2 + $0x124] ss:$28 sps:$4 sm:$0xff]  }
  0x72   :  { %1277 = vmatprep.subr.bf16.mxu1 %v2745_v55  ;;  %v2877_v55 = vld [vmem:[#allocation5 + $0x304] ss:$8 sps:$4 sm:$0xff]  }
  0x74   :  { %1165 = vmatpush2.bf16.msra.mxu0 %v2747_v56  ;;  %v2875_v56 = vld [vmem:[#allocation5 + $0x300] ss:$8 sps:$4 sm:$0xff]  }
  0x75   :  { %1278 = vmatpush2.bf16.msra.mxu1 %v2748_v57  ;;  %1166 = vmatprep.subr.bf16.mxu0 %v2749_v58  ;;  %v2833_v57 = vld [vmem:[#allocation5 + $0x2e0] ss:$8 sps:$4 sm:$0xff]   ;;  %v2840_v58 = vld [vmem:[#allocation2 + $0x118] ss:$28 sps:$4 sm:$0xff]  }
  0x76   :  { %1279 = vmatprep.subr.bf16.mxu1 %v2751_v59  ;;  %v2841_v59 = vld [vmem:[#allocation2 + $0x120] ss:$28 sps:$4 sm:$0xff]  }
  0x78   :  { %1167 = vmatpush2.bf16.msra.mxu0 %v2753_v60  ;;  %v2844_v60 = vld [vmem:[#allocation5 + $0x2d4] ss:$8 sps:$4 sm:$0xff]  }
  0x79   :  { %1280 = vmatpush2.bf16.msra.mxu1 %v2754_v61  ;;  %1168 = vmatprep.subr.bf16.mxu0 %v2755_v62  ;;  %v2842_v61 = vld [vmem:[#allocation5 + $0x2d0] ss:$8 sps:$4 sm:$0xff]   ;;  %v2850_v62 = vld [vmem:[#allocation5 + $0x2c4] ss:$8 sps:$4 sm:$0xff]  }
  0x7a   :  { %1281 = vmatprep.subr.bf16.mxu1 %v2757_v63  ;;  %v2851_v63 = vld [vmem:[#allocation2 + $0x154] ss:$28 sps:$4 sm:$0xff]  }
  0x7c   :  { %1169 = vmatpush2.bf16.msra.mxu0 %v2759_v0  ;;  %v2853_v0 = vld [vmem:[#allocation2 + $0x15c] ss:$28 sps:$4 sm:$0xff]  }
  0x7d   :  { %1282 = vmatpush2.bf16.msra.mxu1 %v2760_v1  ;;  %1364 = vmatprep.subr.bf16.mxu0 %v2769_v2  ;;  %v2848_v1 = vld [vmem:[#allocation5 + $0x2c0] ss:$8 sps:$4 sm:$0xff]   ;;  %v2855_v2 = vld [vmem:[#allocation2 + $0x150] ss:$28 sps:$4 sm:$0xff]  }
  0x7e   :  { %1477 = vmatprep.subr.bf16.mxu1 %v2772_v3  ;;  %v2859_v3 = vld [vmem:[#allocation5 + $0x2b4] ss:$8 sps:$4 sm:$0xff]  }
  0x7f   :  { %1171 = vmatmul.mubr.bf16.vlgmr.msra.gmra.mxu0 %v2761_v4  ;;  %v2856_v4 = vld [vmem:[#allocation2 + $0x158] ss:$28 sps:$4 sm:$0xff]  }
  0x80   :  { %1284 = vmatmul.mubr.bf16.vlgmr.msra.gmra.mxu1 %v2764_v5  ;;  %1365 = vmatpush1.bf16.msra.mxu0 %v2767_v6  ;;  %v2857_v5 = vld [vmem:[#allocation5 + $0x2b0] ss:$8 sps:$4 sm:$0xff]   ;;  %v2866_v6 = vld [vmem:[#allocation2 + $0x18c] ss:$28 sps:$4 sm:$0xff]  }
  0x81   :  { %1478 = vmatpush1.bf16.msra.mxu1 %v2770_v7  ;;  %1366 = vmatprep.subr.bf16.mxu0 %v2775_v8  ;;  %v2865_v7 = vld [vmem:[#allocation5 + $0x2a4] ss:$8 sps:$4 sm:$0xff]   ;;  %v2868_v8 = vld [vmem:[#allocation2 + $0x194] ss:$28 sps:$4 sm:$0xff]  }
  0x82   :  { %1180 = vmatprep.mubr.bf16.mxu0 %v2776_v9  ;;  %1293 = vmatprep.mubr.bf16.mxu1 %v2778_v10  ;;  %v2863_v9 = vld [vmem:[#allocation5 + $0x2a0] ss:$8 sps:$4 sm:$0xff]   ;;  %v2874_v10 = vld [vmem:[#allocation5 + $0x294] ss:$8 sps:$4 sm:$0xff]  }
  0x83   :  { %1479 = vmatprep.subr.bf16.mxu1 %v2787_v11  ;;  %v2870_v11 = vld [vmem:[#allocation2 + $0x188] ss:$28 sps:$4 sm:$0xff]  }
  0x84   :  { %1367 = vmatpush1.bf16.msra.mxu0 %v2773_v12  ;;  %v2871_v12 = vld [vmem:[#allocation2 + $0x190] ss:$28 sps:$4 sm:$0xff]  }
  0x85   :  { %1480 = vmatpush1.bf16.msra.mxu1 %v2785_v14  ;;  %1368 = vmatprep.subr.bf16.mxu0 %v2784_v13  ;;  %v2872_v13 = vld [vmem:[#allocation5 + $0x290] ss:$8 sps:$4 sm:$0xff]  }
  0x86   :  { %1481 = vmatprep.subr.bf16.mxu1 %v2802_v15  ;;  %v2883_v14 = vld [vmem:[#allocation2 + $0x14] ss:$28 sps:$4 sm:$0xff]   ;;  %v2880_v15 = vld [vmem:[#allocation5 + $0x284] ss:$8 sps:$4 sm:$0xff]  }
  0x87   :  { %1181 = vmatmul.mubr.bf16.gmra.mxu0 %v2780_v16  ;;  %v2878_v16 = vld [vmem:[#allocation5 + $0x280] ss:$8 sps:$4 sm:$0xff]  }
  0x88   :  { %1294 = vmatmul.mubr.bf16.gmra.mxu1 %v2781_v17  ;;  %1369 = vmatpush1.bf16.msra.mxu0 %v2782_v18  ;;  %v2881_v17 = vld [vmem:[#allocation2 + $0x10] ss:$28 sps:$4 sm:$0xff]   ;;  %v3084_v18 = vmov 0  }
  0x89   :  { %1190 = vmatprep.mubr.bf16.mxu0 %v2791_v20  ;;  %1370 = vmatprep.subr.bf16.mxu0 %v2790_v19  ;;  %v2884_v19 = vld [vmem:[#allocation2 + $0x18] ss:$28 sps:$4 sm:$0xff]   ;;  %v2885_v20 = vld [vmem:[#allocation2 + $0x4c] ss:$28 sps:$4 sm:$0xff]  }
  0x8a   :  { %1303 = vmatprep.mubr.bf16.mxu1 %v2793_v21  ;;  %1482 = vmatpush1.bf16.msra.mxu1 %v2800_v22  ;;  %v2887_v21 = vld [vmem:[#allocation2 + $0x48] ss:$28 sps:$4 sm:$0xff]   ;;  %v2888_v22 = vld [vmem:[#allocation2 + $0x50] ss:$28 sps:$4 sm:$0xff]  }
  0x8b   :  { %1483 = vmatprep.subr.bf16.mxu1 %v2817_v23  ;;  %v2889_v23 = vld [vmem:[#allocation2 + $0x84] ss:$28 sps:$4 sm:$0xff]  }
  0x8c   :  { %1371 = vmatpush1.bf16.msra.mxu0 %v2788_v24  ;;  %v2891_v24 = vld [vmem:[#allocation2 + $0x80] ss:$28 sps:$4 sm:$0xff]  }
  0x8d   :  { %1372 = vmatprep.subr.bf16.mxu0 %v2799_v26  ;;  %v2893_v26 = vld [vmem:[#allocation2 + $0xbc] ss:$28 sps:$4 sm:$0xff]  }
  0x8e   :  { %1484 = vmatpush1.bf16.msra.mxu1 %v2815_v28  ;;  %v2914_v28 = vld [vmem:[#allocation7 + $0x38] sm:$0xff]  }
  0x8f   :  { %1191 = vmatmul.mubr.bf16.gmra.mxu0 %v2795_v25  ;;  %1485 = vmatprep.subr.bf16.mxu1 %v2832_v33  ;;  %v2892_v25 = vld [vmem:[#allocation2 + $0x88] ss:$28 sps:$4 sm:$0xff]   ;;  %v2916_v33 = vld [vmem:[#allocation7 + $0x30] sm:$0xff]  }
  0x90   :  { %1304 = vmatmul.mubr.bf16.gmra.mxu1 %v2796_v27  ;;  %1373 = vmatpush1.bf16.msra.mxu0 %v2797_v29  ;;  %v2913_v27 = vld [vmem:[#allocation7 + $0x78] sm:$0xff]  }
  0x91   :  { %1200 = vmatprep.mubr.bf16.mxu0 %v2806_v31  ;;  %1374 = vmatprep.subr.bf16.mxu0 %v2805_v30  ;;  %v2895_v29 = vld [vmem:[#allocation2 + $0xb8] ss:$28 sps:$4 sm:$0xff]   ;;  %v2896_v30 = vld [vmem:[#allocation2 + $0xc0] ss:$28 sps:$4 sm:$0xff]  }
  0x92   :  { %1313 = vmatprep.mubr.bf16.mxu1 %v2808_v32  ;;  %1486 = vmatpush1.bf16.msra.mxu1 %v2830_v34  ;;  %v2897_v31 = vld [vmem:[#allocation2 + $0xf4] ss:$28 sps:$4 sm:$0xff]  }
  0x93   :  { %1487 = vmatprep.subr.bf16.mxu1 %v2847_v36  ;;  %v2915_v32 = vld [vmem:[#allocation7 + $0x70] sm:$0xff]   ;;  %v2901_v36 = vld [vmem:[#allocation2 + $0x12c] ss:$28 sps:$4 sm:$0xff]  }
  0x94   :  { %1375 = vmatpush1.bf16.msra.mxu0 %v2803_v35  ;;  %v2899_v34 = vld [vmem:[#allocation2 + $0xf0] ss:$28 sps:$4 sm:$0xff]   ;;  %v2900_v35 = vld [vmem:[#allocation2 + $0xf8] ss:$28 sps:$4 sm:$0xff]  }
  0x95   :  { %1376 = vmatprep.subr.bf16.mxu0 %v2814_v37  ;;  %v2917_v37 = vld [vmem:[#allocation7 + $0x68] sm:$0xff]  }
  0x96   :  { %1488 = vmatpush1.bf16.msra.mxu1 %v2845_v44  ;;  %v2907_v44 = vld [vmem:[#allocation2 + $0x160] ss:$28 sps:$4 sm:$0xff]  }
  0x97   :  { %1201 = vmatmul.mubr.bf16.gmra.mxu0 %v2810_v38  ;;  %1489 = vmatprep.subr.bf16.mxu1 %v2862_v45  ;;  %v2918_v38 = vld [vmem:[#allocation7 + $0x28] sm:$0xff]  }
  0x98   :  { %1314 = vmatmul.mubr.bf16.gmra.mxu1 %v2811_v39  ;;  %1377 = vmatpush1.bf16.msra.mxu0 %v2812_v40  ;;  %v2903_v39 = vld [vmem:[#allocation2 + $0x128] ss:$28 sps:$4 sm:$0xff]   ;;  %v2904_v40 = vld [vmem:[#allocation2 + $0x130] ss:$28 sps:$4 sm:$0xff]  }
  0x99   :  { %1210 = vmatprep.mubr.bf16.mxu0 %v2821_v42  ;;  %1378 = vmatprep.subr.bf16.mxu0 %v2820_v41  ;;  %v2905_v41 = vld [vmem:[#allocation2 + $0x164] ss:$28 sps:$4 sm:$0xff]  }
  0x9a   :  { %1323 = vmatprep.mubr.bf16.mxu1 %v2823_v43  ;;  %1490 = vmatpush1.bf16.msra.mxu1 %v2860_v50  ;;  %v2919_v42 = vld [vmem:[#allocation7 + $0x60] sm:$0xff]  }
  0x9b   :  { %1491 = vmatprep.subr.bf16.mxu1 %v2877_v55  ;;  %v2920_v43 = vld [vmem:[#allocation7 + $0x20] sm:$0xff]  }
  0x9c   :  { %1379 = vmatpush1.bf16.msra.mxu0 %v2818_v46  ;;  %v2908_v45 = vld [vmem:[#allocation2 + $0x168] ss:$28 sps:$4 sm:$0xff]   ;;  %v2909_v46 = vld [vmem:[#allocation2 + $0x19c] ss:$28 sps:$4 sm:$0xff]  }
  0x9d   :  { %1380 = vmatprep.subr.bf16.mxu0 %v2829_v48  ;;  %v2922_v48 = vld [vmem:[#allocation7 + $0x18] sm:$0xff]   ;;  %v2927_v55 = vld [vmem:[#allocation7 + $0x40] sm:$0xff]  }
  0x9e   :  { %1492 = vmatpush1.bf16.msra.mxu1 %v2875_v56  ;;  %v2912_v50 = vld [vmem:[#allocation2 + $0x1a0] ss:$28 sps:$4 sm:$0xff]  }
  0x9f   :  { %1211 = vmatmul.mubr.bf16.gmra.mxu0 %v2825_v47  ;;  %v2921_v47 = vld [vmem:[#allocation7 + $0x58] sm:$0xff]   ;;  %v2928_v56 = vld [vmem:[#allocation7] sm:$0xff]  }
  0xa0   :  { %1324 = vmatmul.mubr.bf16.gmra.mxu1 %v2826_v49  ;;  %1381 = vmatpush2.bf16.msra.mxu0 %v2827_v51  ;;  %v2911_v49 = vld [vmem:[#allocation2 + $0x198] ss:$28 sps:$4 sm:$0xff]  }
  0xa1   :  { %1220 = vmatprep.mubr.bf16.mxu0 %v2836_v53  ;;  %1382 = vmatprep.subr.bf16.mxu0 %v2835_v52  ;;  %v2923_v51 = vld [vmem:[#allocation7 + $0x50] sm:$0xff]   ;;  %v2925_v53 = vld [vmem:[#allocation7 + $0x48] sm:$0xff]  }
  0xa2   :  { %1333 = vmatprep.mubr.bf16.mxu1 %v2838_v54  ;;  %v2924_v52 = vld [vmem:[#allocation7 + $0x10] sm:$0xff]   ;;  %v2926_v54 = vld [vmem:[#allocation7 + $0x8] sm:$0xff]  }
  0xa4   :  { %1383 = vmatpush2.bf16.msra.mxu0 %v2833_v57  ;;  %v280_v57 = vlaneseq }
  0xa5   :  { %1384 = vmatprep.subr.bf16.mxu0 %v2844_v60  ;;  %v278_v60 = vld [vmem:[%s3389_s2] sm:$0x3] }
  0xa7   :  { %1221 = vmatmul.mubr.bf16.gmra.mxu0 %v2840_v58  ;;  %v281_v58 = vshrl.u32 %v280_v57, 7 }
  0xa8   :  { %1334 = vmatmul.mubr.bf16.gmra.mxu1 %v2841_v59  ;;  %1385 = vmatpush2.bf16.msra.mxu0 %v2842_v61 }
  0xa9   :  { %1230 = vmatprep.mubr.bf16.mxu0 %v2851_v63  ;;  %1386 = vmatprep.subr.bf16.mxu0 %v2850_v62  ;;  %v282_v59 = vsub.s32 0, %v281_v58  ;;  %v286_v61 = vsub.s32 1, %v281_v58 }
  0xaa   :  { %1343 = vmatprep.mubr.bf16.mxu1 %v2853_v0 }
  0xab   :  { %v3174_v62 = vrot.slane %v278_v60, %v282_v59  ;;  %v3176_v63 = vrot.slane %v278_v60, %v286_v61 }
  0xac   :  { %1387 = vmatpush2.bf16.msra.mxu0 %v2848_v1 }
  0xad   :  { %1388 = vmatprep.subr.bf16.mxu0 %v2859_v3 }
  0xaf   :  { %1231 = vmatmul.mubr.bf16.gmra.mxu0 %v2855_v2 }
  0xb0   :  { %1344 = vmatmul.mubr.bf16.gmra.mxu1 %v2856_v4  ;;  %1389 = vmatpush2.bf16.msra.mxu0 %v2857_v5 }
  0xb1   :  { %1240 = vmatprep.mubr.bf16.mxu0 %v2866_v6  ;;  %1390 = vmatprep.subr.bf16.mxu0 %v2865_v7 }
  0xb2   :  { %1353 = vmatprep.mubr.bf16.mxu1 %v2868_v8 }
  0xb4   :  { %1391 = vmatpush2.bf16.msra.mxu0 %v2863_v9 }
  0xb5   :  { %1392 = vmatprep.subr.bf16.mxu0 %v2874_v10 }
  0xb7   :  { %1241 = vmatmul.mubr.bf16.gmra.mxu0 %v2870_v11 }
  0xb8   :  { %1354 = vmatmul.mubr.bf16.gmra.mxu1 %v2871_v12  ;;  %1393 = vmatpush2.bf16.msra.mxu0 %v2872_v13 }
  0xb9   :  { %1396 = vmatprep.mubr.bf16.mxu0 %v2883_v14  ;;  %1394 = vmatprep.subr.bf16.mxu0 %v2880_v15  ;;  %v2929_v14 = vld [vmem:[#allocation8 + $0x38] sm:$0xff]   ;;  %v2930_v15 = vld [vmem:[#allocation8 + $0x30] sm:$0xff]  }
  0xba   :  { %1509 = vmatprep.mubr.bf16.mxu1 %v3084_v18  ;;  %2588 = vmatprep.subr.bf16.mxu1 %v2929_v14 }
  0xbc   :  { %1395 = vmatpush2.bf16.msra.mxu0 %v2878_v16 }
  0xbd   :  { %2492 = vmatprep.subr.bf16.mxu0 %v2913_v27 }
  0xbf   :  { %1397 = vmatmul.mubr.bf16.vlgmr.msra.gmra.mxu0 %v2881_v17 }
  0xc0   :  { %1510 = vmatmul.mubr.bf16.vlgmr.msra.gmra.mxu1 %v2884_v19  ;;  %1406 = vmatprep.mubr.bf16.mxu0 %v2885_v20 }
  0xc1   :  { %1519 = vmatprep.mubr.bf16.mxu1 %v3084_v18  ;;  %2493 = vmatpush3.bf16.msra.mxu0 %v2914_v28 }
  0xc2   :  { %2494 = vmatprep.subr.bf16.mxu0 %v2915_v32  ;;  %2589 = vmatpush3.bf16.msra.mxu1 %v2929_v14 }
  0xc3   :  { %2590 = vmatprep.subr.bf16.mxu1 %v2930_v15 }
  0xc5   :  { %2495 = vmatpush3.bf16.msra.mxu0 %v2916_v33 }
  0xc6   :  { %2496 = vmatprep.subr.bf16.mxu0 %v2917_v37  ;;  %2591 = vmatpush3.bf16.msra.mxu1 %v2930_v15 }
  0xc7   :  { %1407 = vmatmul.mubr.bf16.gmra.mxu0 %v2887_v21 }
  0xc8   :  { %1520 = vmatmul.mubr.bf16.gmra.mxu1 %v2888_v22  ;;  %1416 = vmatprep.mubr.bf16.mxu0 %v2889_v23  ;;  %v2931_v23 = vld [vmem:[#allocation8 + $0x28] sm:$0xff]  }
  0xc9   :  { %1529 = vmatprep.mubr.bf16.mxu1 %v3084_v18  ;;  %2497 = vmatpush3.bf16.msra.mxu0 %v2918_v38 }
  0xca   :  { %2498 = vmatprep.subr.bf16.mxu0 %v2919_v42  ;;  %2592 = vmatprep.subr.bf16.mxu1 %v2931_v23 }
  0xcb   :  { %2593 = vmatpush3.bf16.msra.mxu1 %v2931_v23 }
  0xcd   :  { %2499 = vmatpush3.bf16.msra.mxu0 %v2920_v43 }
  0xce   :  { %2500 = vmatprep.subr.bf16.mxu0 %v2921_v47 }
  0xcf   :  { %1417 = vmatmul.mubr.bf16.gmra.mxu0 %v2891_v24 }
  0xd0   :  { %1530 = vmatmul.mubr.bf16.gmra.mxu1 %v2892_v25  ;;  %1426 = vmatprep.mubr.bf16.mxu0 %v2893_v26 }
  0xd1   :  { %1539 = vmatprep.mubr.bf16.mxu1 %v3084_v18  ;;  %2501 = vmatpush3.bf16.msra.mxu0 %v2922_v48 }
  0xd2   :  { %2502 = vmatprep.subr.bf16.mxu0 %v2923_v51 }
  0xd5   :  { %2503 = vmatpush3.bf16.msra.mxu0 %v2924_v52 }
  0xd6   :  { %2504 = vmatprep.subr.bf16.mxu0 %v2925_v53 }
  0xd7   :  { %1427 = vmatmul.mubr.bf16.gmra.mxu0 %v2895_v29 }
  0xd8   :  { %1540 = vmatmul.mubr.bf16.gmra.mxu1 %v2896_v30  ;;  %1436 = vmatprep.mubr.bf16.mxu0 %v2897_v31 }
  0xd9   :  { %1549 = vmatprep.mubr.bf16.mxu1 %v3084_v18  ;;  %2505 = vmatpush3.bf16.msra.mxu0 %v2926_v54 }
  0xda   :  { %2506 = vmatprep.subr.bf16.mxu0 %v2927_v55 }
  0xdd   :  { %2507 = vmatpush3.bf16.msra.mxu0 %v2928_v56 }
  0xdf   :  { %1437 = vmatmul.mubr.bf16.gmra.mxu0 %v2899_v34 }
  0xe0   :  { %1550 = vmatmul.mubr.bf16.gmra.mxu1 %v2900_v35  ;;  %1446 = vmatprep.mubr.bf16.mxu0 %v2901_v36 }
  0xe1   :  { %1559 = vmatprep.mubr.bf16.mxu1 %v3084_v18 }
  0xe7   :  { %1447 = vmatmul.mubr.bf16.gmra.mxu0 %v2903_v39 }
  0xe8   :  { %1560 = vmatmul.mubr.bf16.gmra.mxu1 %v2904_v40  ;;  %1456 = vmatprep.mubr.bf16.mxu0 %v2905_v41 }
  0xe9   :  { %1569 = vmatprep.mubr.bf16.mxu1 %v3084_v18 }
  0xef   :  { %1457 = vmatmul.mubr.bf16.gmra.mxu0 %v2907_v44 }
  0xf0   :  { %1570 = vmatmul.mubr.bf16.gmra.mxu1 %v2908_v45  ;;  %1466 = vmatprep.mubr.bf16.mxu0 %v2909_v46 }
  0xf1   :  { %1579 = vmatprep.mubr.bf16.mxu1 %v3084_v18 }
  0xf7   :  { %1467 = vmatmul.mubr.bf16.gmra.mxu0 %v2911_v49 }
  0xf8   :  { %1580 = vmatmul.mubr.bf16.gmra.mxu1 %v2912_v50 }
 0x13f   :  { %v1172_v0 = vpop.f32.mrf.mxu0 }
 0x140   :  { %v1285_v1 = vpop.f32.mrf.mxu1  ;;  %v1173_v2 = vadd.f32 %v1172_v0, %v3174_v62 }
 0x141   :  { %v1174_v3 = vpop.f32.mrf.mxu0 }
 0x142   :  { %v1287_v4 = vpop.f32.mrf.mxu1  ;;  %v3179_v5 = vadd.f32 %v1285_v1, %v1173_v2  ;;  %v1175_v6 = vadd.f32 %v1174_v3, %v3176_v63 }
 0x143   :  { %v3182_v7 = vpop.f32.mrf.mxu0 }
 0x144   :  { %v3184_v8 = vpop.f32.mrf.mxu1  ;;  %v3186_v9 = vadd.f32 %v1287_v4, %v1175_v6 }
 0x145   :  { %v3188_v10 = vpop.f32.mrf.mxu0 }
 0x146   :  { %v3190_v11 = vpop.f32.mrf.mxu1 }
 0x147   :  { %v1182_v12 = vpop.f32.mrf.mxu0 }
 0x148   :  { %v1295_v13 = vpop.f32.mrf.mxu1  ;;  %v1183_v16 = vadd.f32 %v1182_v12, %v3174_v62 }
 0x149   :  { %v1184_v17 = vpop.f32.mrf.mxu0 }
 0x14a   :  { %v1297_v18 = vpop.f32.mrf.mxu1  ;;  %v3193_v19 = vadd.f32 %v1295_v13, %v1183_v16  ;;  %v1185_v20 = vadd.f32 %v1184_v17, %v3176_v63 }
 0x14b   :  { %v3196_v21 = vpop.f32.mrf.mxu0 }
 0x14c   :  { %v3198_v22 = vpop.f32.mrf.mxu1  ;;  %v3200_v24 = vadd.f32 %v1297_v18, %v1185_v20 }
 0x14d   :  { %v3202_v25 = vpop.f32.mrf.mxu0 }
 0x14e   :  { %v3204_v26 = vpop.f32.mrf.mxu1 }
 0x14f   :  { %v1192_v27 = vpop.f32.mrf.mxu0 }
 0x150   :  { %v1305_v28 = vpop.f32.mrf.mxu1  ;;  %v1193_v29 = vadd.f32 %v1192_v27, %v3174_v62 }
 0x151   :  { %v1194_v30 = vpop.f32.mrf.mxu0 }
 0x152   :  { %v1307_v31 = vpop.f32.mrf.mxu1  ;;  %v3207_v32 = vadd.f32 %v1305_v28, %v1193_v29  ;;  %v1195_v33 = vadd.f32 %v1194_v30, %v3176_v63 }
 0x153   :  { %v3210_v34 = vpop.f32.mrf.mxu0 }
 0x154   :  { %v3212_v35 = vpop.f32.mrf.mxu1  ;;  %v3214_v36 = vadd.f32 %v1307_v31, %v1195_v33 }
 0x155   :  { %v3216_v37 = vpop.f32.mrf.mxu0 }
 0x156   :  { %v3218_v38 = vpop.f32.mrf.mxu1 }
 0x157   :  { %v1202_v39 = vpop.f32.mrf.mxu0 }
 0x158   :  { %v1315_v40 = vpop.f32.mrf.mxu1  ;;  %v1203_v41 = vadd.f32 %v1202_v39, %v3174_v62 }
 0x159   :  { %v1204_v42 = vpop.f32.mrf.mxu0 }
 0x15a   :  { %v1317_v43 = vpop.f32.mrf.mxu1  ;;  %v3221_v44 = vadd.f32 %v1315_v40, %v1203_v41  ;;  %v1205_v45 = vadd.f32 %v1204_v42, %v3176_v63 }
 0x15b   :  { %v3224_v46 = vpop.f32.mrf.mxu0 }
 0x15c   :  { %v3226_v47 = vpop.f32.mrf.mxu1  ;;  %v3228_v48 = vadd.f32 %v1317_v43, %v1205_v45 }
 0x15d   :  { %v3230_v49 = vpop.f32.mrf.mxu0 }
 0x15e   :  { %v3232_v50 = vpop.f32.mrf.mxu1 }
 0x15f   :  { %v1212_v51 = vpop.f32.mrf.mxu0 }
 0x160   :  { %v1325_v52 = vpop.f32.mrf.mxu1  ;;  %v1213_v53 = vadd.f32 %v1212_v51, %v3174_v62 }
 0x161   :  { %v1214_v54 = vpop.f32.mrf.mxu0 }
 0x162   :  { %v1327_v55 = vpop.f32.mrf.mxu1  ;;  %v3235_v56 = vadd.f32 %v1325_v52, %v1213_v53  ;;  %v1215_v57 = vadd.f32 %v1214_v54, %v3176_v63 }
 0x163   :  { %v3238_v58 = vpop.f32.mrf.mxu0 }
 0x164   :  { %v3240_v59 = vpop.f32.mrf.mxu1  ;;  %v3242_v60 = vadd.f32 %v1327_v55, %v1215_v57 }
 0x165   :  { %v3244_v61 = vpop.f32.mrf.mxu0 }
 0x166   :  { %v3246_v0 = vpop.f32.mrf.mxu1 }
 0x167   :  { %v1222_v1 = vpop.f32.mrf.mxu0 }
 0x168   :  { %v1335_v2 = vpop.f32.mrf.mxu1  ;;  %v1223_v3 = vadd.f32 %v1222_v1, %v3174_v62 }
 0x169   :  { %v1224_v4 = vpop.f32.mrf.mxu0 }
 0x16a   :  { %v1337_v6 = vpop.f32.mrf.mxu1  ;;  %v3249_v12 = vadd.f32 %v1335_v2, %v1223_v3  ;;  %v1225_v13 = vadd.f32 %v1224_v4, %v3176_v63 }
 0x16b   :  { %v3252_v14 = vpop.f32.mrf.mxu0 }
 0x16c   :  { %v3254_v15 = vpop.f32.mrf.mxu1  ;;  %v3256_v16 = vadd.f32 %v1337_v6, %v1225_v13  ;;  %v1177_v6 = vadd.f32 %v3182_v7, %v3174_v62 }
 0x16d   :  { %v3258_v17 = vpop.f32.mrf.mxu0 }
 0x16e   :  { %v3260_v18 = vpop.f32.mrf.mxu1 }
 0x16f   :  { %v1232_v20 = vpop.f32.mrf.mxu0 }
 0x170   :  { %v1345_v23 = vpop.f32.mrf.mxu1  ;;  %v1233_v27 = vadd.f32 %v1232_v20, %v3174_v62 }
 0x171   :  { %v1234_v28 = vpop.f32.mrf.mxu0 }
 0x172   :  { %v1347_v29 = vpop.f32.mrf.mxu1  ;;  %v3263_v30 = vadd.f32 %v1345_v23, %v1233_v27  ;;  %v1235_v31 = vadd.f32 %v1234_v28, %v3176_v63  ;;  %v1179_v23 = vadd.f32 %v3188_v10, %v3176_v63 }
 0x173   :  { %v3266_v33 = vpop.f32.mrf.mxu0 }
 0x174   :  { %v3268_v39 = vpop.f32.mrf.mxu1  ;;  %v3270_v40 = vadd.f32 %v1347_v29, %v1235_v31  ;;  %v1290_v29 = vadd.f32 %v3184_v8, %v1177_v6 }
 0x175   :  { %v3272_v41 = vpop.f32.mrf.mxu0 }
 0x176   :  { %v3274_v42 = vpop.f32.mrf.mxu1 }
 0x177   :  { %v1242_v43 = vpop.f32.mrf.mxu0 }
 0x178   :  { %v1355_v45 = vpop.f32.mrf.mxu1  ;;  %v1243_v51 = vadd.f32 %v1242_v43, %v3174_v62 }
 0x179   :  { %v1244_v52 = vpop.f32.mrf.mxu0 }
 0x17a   :  { %v1357_v53 = vpop.f32.mrf.mxu1  ;;  %v3277_v54 = vadd.f32 %v1355_v45, %v1243_v51  ;;  %v1245_v55 = vadd.f32 %v1244_v52, %v3176_v63  ;;  %v1292_v52 = vadd.f32 %v3190_v11, %v1179_v23 }
 0x17b   :  { %v3280_v57 = vpop.f32.mrf.mxu0 }
 0x17c   :  { %3397 = vst [vmem:[#allocation16_spill] sm:$0xff] %v3277_v54  ;;  %v3282_v1 = vpop.f32.mrf.mxu1  ;;  %v3284_v2 = vadd.f32 %v1357_v53, %v1245_v55 }
 0x17d   :  { %3398 = vst [vmem:[#allocation17_spill] sm:$0xff] %v3282_v1  ;;  %v3286_v3 = vpop.f32.mrf.mxu0 }
 0x17e   :  { %3399 = vst [vmem:[#allocation18_spill] sm:$0xff] %v3284_v2  ;;  %3400 = vst [vmem:[#allocation19_spill] sm:$0xff] %v3286_v3  ;;  %v3288_v4 = vpop.f32.mrf.mxu1 }
 0x17f   :  { %3401 = vst [vmem:[#allocation20_spill] sm:$0xff] %v3288_v4  ;;  %v1398_v13 = vpop.f32.mrf.mxu0  ;;  %v1187_v4 = vadd.f32 %v3196_v21, %v3174_v62 }
 0x180   :  { %v1511_v20 = vpop.f32.mrf.mxu1  ;;  %v1399_v43 = vadd.f32 %v1398_v13, %v3179_v5 }
 0x181   :  { %v1400_v27 = vpop.f32.mrf.mxu0  ;;  %v1300_v11 = vadd.f32 %v3198_v22, %v1187_v4 }
 0x182   :  { %v1513_v28 = vpop.f32.mrf.mxu1  ;;  %v1401_v31 = vadd.f32 %v1400_v27, %v3186_v9  ;;  %v1512_v1 = vadd.f32 %v1511_v20, %v1399_v43  ;;  %v1189_v9 = vadd.f32 %v3202_v25, %v3176_v63 }
 0x183   :  { %v1402_v45 = vpop.f32.mrf.mxu0 }
 0x184   :  { %v1515_v51 = vpop.f32.mrf.mxu1  ;;  %v1403_v53 = vadd.f32 %v1402_v45, %v1290_v29  ;;  %v1514_v54 = vadd.f32 %v1513_v28, %v1401_v31  ;;  %v1590_v21 = vmax.f32 %v1512_v1, 0.0  ;;  %v1302_v43 = vadd.f32 %v3204_v26, %v1189_v9 }
 0x185   :  { %v1404_v55 = vpop.f32.mrf.mxu0 }
 0x186   :  { %v1517_v7 = vpop.f32.mrf.mxu1  ;;  %v1516_v10 = vadd.f32 %v1515_v51, %v1403_v53  ;;  %v1405_v2 = vadd.f32 %v1404_v55, %v1292_v52  ;;  %v1591_v23 = vmax.f32 %v1514_v54, 0.0  ;;  %v1197_v55 = vadd.f32 %v3210_v34, %v3174_v62 }
 0x187   :  { %v1408_v3 = vpop.f32.mrf.mxu0 }
 0x188   :  { %v1521_v8 = vpop.f32.mrf.mxu1  ;;  %v1518_v5 = vadd.f32 %v1517_v7, %v1405_v2  ;;  %v1592_v6 = vmax.f32 %v1516_v10, 0.0  ;;  %v1409_v28 = vadd.f32 %v1408_v3, %v3193_v19  ;;  %v1199_v19 = vadd.f32 %v3216_v37, %v3176_v63 }
 0x189   :  { %v1410_v13 = vpop.f32.mrf.mxu0 }
 0x18a   :  { %v1523_v27 = vpop.f32.mrf.mxu1  ;;  %v1593_v29 = vmax.f32 %v1518_v5, 0.0  ;;  %v1411_v45 = vadd.f32 %v1410_v13, %v3200_v24  ;;  %v1622_v25 = vpack.c.bf16 %v1592_v6, %v1590_v21  ;;  %v1522_v24 = vadd.f32 %v1521_v8, %v1409_v28 }
 0x18b   :  { %v1412_v31 = vpop.f32.mrf.mxu0  ;;  %v1310_v5 = vadd.f32 %v3212_v35, %v1197_v55 }
 0x18c   :  { %v1525_v20 = vpop.f32.mrf.mxu1  ;;  %v1623_v51 = vpack.c.bf16 %v1593_v29, %v1591_v23  ;;  %v1413_v52 = vadd.f32 %v1412_v31, %v1300_v11  ;;  %v1524_v22 = vadd.f32 %v1523_v27, %v1411_v45  ;;  %v1594_v27 = vmax.f32 %v1522_v24, 0.0 }
 0x18d   :  { %v1414_v2 = vpop.f32.mrf.mxu0  ;;  %v1312_v29 = vadd.f32 %v3218_v38, %v1199_v19 }
 0x18e   :  { %v1527_v53 = vpop.f32.mrf.mxu1  ;;  %v1526_v54 = vadd.f32 %v1525_v20, %v1413_v52  ;;  %v1415_v4 = vadd.f32 %v1414_v2, %v1302_v43  ;;  %1805 = vmatprep.mubr.bf16.mxu0 %v1623_v51  ;;  %v1595_v6 = vmax.f32 %v1524_v22, 0.0  ;;  %v1207_v20 = vadd.f32 %v3224_v46, %v3174_v62 }
 0x18f   :  { %v1418_v1 = vpop.f32.mrf.mxu0  ;;  %1806 = vmatmul.mubr.bf16.vlgmr.msra.gmra.mxu0 %v1622_v25 }
 0x190   :  { %v1531_v7 = vpop.f32.mrf.mxu1  ;;  %v1528_v26 = vadd.f32 %v1527_v53, %v1415_v4  ;;  %v1596_v3 = vmax.f32 %v1526_v54, 0.0  ;;  %v1419_v11 = vadd.f32 %v1418_v1, %v3207_v32  ;;  %v1209_v32 = vadd.f32 %v3230_v49, %v3176_v63 }
 0x191   :  { %v1420_v10 = vpop.f32.mrf.mxu0  ;;  %v1320_v22 = vadd.f32 %v3226_v47, %v1207_v20 }
 0x192   :  { %v1533_v9 = vpop.f32.mrf.mxu1  ;;  %v1597_v13 = vmax.f32 %v1528_v26, 0.0  ;;  %v1421_v34 = vadd.f32 %v1420_v10, %v3214_v36  ;;  %v1624_v37 = vpack.c.bf16 %v1596_v3, %v1594_v27  ;;  %v1532_v36 = vadd.f32 %v1531_v7, %v1419_v11 }
 0x193   :  { %v1422_v8 = vpop.f32.mrf.mxu0  ;;  %v1322_v26 = vadd.f32 %v3232_v50, %v1209_v32  ;;  %v1227_v32 = vadd.f32 %v3252_v14, %v3174_v62 }
 0x194   :  { %v1535_v23 = vpop.f32.mrf.mxu1  ;;  %v1625_v45 = vpack.c.bf16 %v1597_v13, %v1595_v6  ;;  %v1423_v21 = vadd.f32 %v1422_v8, %v1310_v5  ;;  %v1534_v35 = vadd.f32 %v1533_v9, %v1421_v34  ;;  %v1598_v24 = vmax.f32 %v1532_v36, 0.0 }
 0x195   :  { %v1424_v28 = vpop.f32.mrf.mxu0  ;;  %v1217_v6 = vadd.f32 %v3238_v58, %v3174_v62 }
 0x196   :  { %v1537_v31 = vpop.f32.mrf.mxu1  ;;  %v1536_v43 = vadd.f32 %v1535_v23, %v1423_v21  ;;  %v1425_v51 = vadd.f32 %v1424_v28, %v1312_v29  ;;  %1813 = vmatprep.mubr.bf16.mxu0 %v1625_v45  ;;  %v1599_v54 = vmax.f32 %v1534_v35, 0.0 }
 0x197   :  { %v1428_v52 = vpop.f32.mrf.mxu0  ;;  %1814 = vmatmul.mubr.bf16.gmra.mxu0 %v1624_v37  ;;  %v1330_v45 = vadd.f32 %v3240_v59, %v1217_v6 }
 0x198   :  { %v1541_v25 = vpop.f32.mrf.mxu1  ;;  %v1538_v38 = vadd.f32 %v1537_v31, %v1425_v51  ;;  %v1600_v2 = vmax.f32 %v1536_v43, 0.0  ;;  %v1429_v1 = vadd.f32 %v1428_v52, %v3221_v44  ;;  %v1219_v44 = vadd.f32 %v3244_v61, %v3176_v63 }
 0x199   :  { %v1430_v53 = vpop.f32.mrf.mxu0 }
 0x19a   :  { %v1543_v55 = vpop.f32.mrf.mxu1  ;;  %v1601_v4 = vmax.f32 %v1538_v38, 0.0  ;;  %v1431_v46 = vadd.f32 %v1430_v53, %v3228_v48  ;;  %v1626_v49 = vpack.c.bf16 %v1600_v2, %v1598_v24  ;;  %v1542_v48 = vadd.f32 %v1541_v25, %v1429_v1 }
 0x19b   :  { %v1432_v7 = vpop.f32.mrf.mxu0  ;;  %v1332_v43 = vadd.f32 %v3246_v0, %v1219_v44 }
 0x19c   :  { %v1545_v19 = vpop.f32.mrf.mxu1  ;;  %v1627_v3 = vpack.c.bf16 %v1601_v4, %v1599_v54  ;;  %v1433_v10 = vadd.f32 %v1432_v7, %v1320_v22  ;;  %v1544_v47 = vadd.f32 %v1543_v55, %v1431_v46  ;;  %v1602_v28 = vmax.f32 %v1542_v48, 0.0 }
 0x19d   :  { %v1434_v9 = vpop.f32.mrf.mxu0  ;;  %v1340_v46 = vadd.f32 %v3254_v15, %v1227_v32 }
 0x19e   :  { %v1547_v5 = vpop.f32.mrf.mxu1  ;;  %v1546_v13 = vadd.f32 %v1545_v19, %v1433_v10  ;;  %v1435_v34 = vadd.f32 %v1434_v9, %v1322_v26  ;;  %1821 = vmatprep.mubr.bf16.mxu0 %v1627_v3  ;;  %v1603_v21 = vmax.f32 %v1544_v47, 0.0  ;;  %v1237_v47 = vadd.f32 %v3266_v33, %v3174_v62 }
 0x19f   :  { %v1438_v27 = vpop.f32.mrf.mxu0  ;;  %1822 = vmatmul.mubr.bf16.gmra.mxu0 %v1626_v49 }
 0x1a0   :  { %v1551_v11 = vpop.f32.mrf.mxu1  ;;  %v1548_v50 = vadd.f32 %v1547_v5, %v1435_v34  ;;  %v1604_v8 = vmax.f32 %v1546_v13, 0.0  ;;  %v1439_v31 = vadd.f32 %v1438_v27, %v3235_v56  ;;  %v1229_v56 = vadd.f32 %v3258_v17, %v3176_v63 }
 0x1a1   :  { %v1440_v23 = vpop.f32.mrf.mxu0 }
 0x1a2   :  { %v1553_v29 = vpop.f32.mrf.mxu1  ;;  %v1605_v37 = vmax.f32 %v1548_v50, 0.0  ;;  %v1441_v58 = vadd.f32 %v1440_v23, %v3242_v60  ;;  %v1628_v61 = vpack.c.bf16 %v1604_v8, %v1602_v28  ;;  %v1552_v60 = vadd.f32 %v1551_v11, %v1439_v31 }
 0x1a3   :  { %v1442_v20 = vpop.f32.mrf.mxu0  ;;  %v1342_v10 = vadd.f32 %v3260_v18, %v1229_v56  ;;  %v1350_v8 = vadd.f32 %v3268_v39, %v1237_v47 }
 0x1a4   :  { %v1555_v35 = vpop.f32.mrf.mxu1  ;;  %v1629_v51 = vpack.c.bf16 %v1605_v37, %v1603_v21  ;;  %v1443_v36 = vadd.f32 %v1442_v20, %v1330_v45  ;;  %v1554_v59 = vadd.f32 %v1553_v29, %v1441_v58  ;;  %v1606_v7 = vmax.f32 %v1552_v60, 0.0  ;;  %v3403_v60 = vld [vmem:[#allocation17_spill] sm:$0xff] }
 0x1a5   :  { %v1444_v52 = vpop.f32.mrf.mxu0 }
 0x1a6   :  { %v1557_v25 = vpop.f32.mrf.mxu1  ;;  %v1556_v38 = vadd.f32 %v1555_v35, %v1443_v36  ;;  %v1445_v2 = vadd.f32 %v1444_v52, %v1332_v43  ;;  %1829 = vmatprep.mubr.bf16.mxu0 %v1629_v51  ;;  %v1607_v24 = vmax.f32 %v1554_v59, 0.0  ;;  %v1247_v51 = vadd.f32 %v3280_v57, %v3174_v62  ;;  %v3404_v62 = vld [vmem:[#allocation18_spill] sm:$0xff] }
 0x1a7   :  { %v1448_v53 = vpop.f32.mrf.mxu0  ;;  %1830 = vmatmul.mubr.bf16.gmra.mxu0 %v1628_v61 }
 0x1a8   :  { %v1561_v55 = vpop.f32.mrf.mxu1  ;;  %v1558_v0 = vadd.f32 %v1557_v25, %v1445_v2  ;;  %v1608_v22 = vmax.f32 %v1556_v38, 0.0  ;;  %v1449_v19 = vadd.f32 %v1448_v53, %v3249_v12  ;;  %v1239_v12 = vadd.f32 %v3272_v41, %v3176_v63 }
 0x1a9   :  { %v1450_v54 = vpop.f32.mrf.mxu0  ;;  %v1360_v53 = vadd.f32 %v3403_v60, %v1247_v51 }
 0x1aa   :  { %v1563_v4 = vpop.f32.mrf.mxu1  ;;  %v1609_v1 = vmax.f32 %v1558_v0, 0.0  ;;  %v1451_v14 = vadd.f32 %v1450_v54, %v3256_v16  ;;  %v1630_v17 = vpack.c.bf16 %v1608_v22, %v1606_v7  ;;  %v1562_v16 = vadd.f32 %v1561_v55, %v1449_v19  ;;  %v3405_v22 = vld [vmem:[#allocation16_spill] sm:$0xff] }
 0x1ab   :  { %v1452_v26 = vpop.f32.mrf.mxu0  ;;  %v1352_v28 = vadd.f32 %v3274_v42, %v1239_v12  ;;  %v2935_v12 = vld [vmem:[#allocation8 + $0x8] sm:$0xff]  }
 0x1ac   :  { %v1565_v3 = vpop.f32.mrf.mxu1  ;;  %v1631_v49 = vpack.c.bf16 %v1609_v1, %v1607_v24  ;;  %v1453_v9 = vadd.f32 %v1452_v26, %v1340_v46  ;;  %v1564_v15 = vadd.f32 %v1563_v4, %v1451_v14  ;;  %v1610_v45 = vmax.f32 %v1562_v16, 0.0  ;;  %v3406_v24 = vld [vmem:[#allocation20_spill] sm:$0xff] }
 0x1ad   :  { %v1454_v5 = vpop.f32.mrf.mxu0  ;;  %v2932_v16 = vld [vmem:[#allocation8 + $0x20] sm:$0xff]  }
 0x1ae   :  { %v1567_v6 = vpop.f32.mrf.mxu1  ;;  %v1566_v13 = vadd.f32 %v1565_v3, %v1453_v9  ;;  %v1455_v34 = vadd.f32 %v1454_v5, %v1342_v10  ;;  %1837 = vmatprep.mubr.bf16.mxu0 %v1631_v49  ;;  %v1611_v23 = vmax.f32 %v1564_v15, 0.0  ;;  %2594 = vmatprep.subr.bf16.mxu1 %v2932_v16 }
 0x1af   :  { %v1458_v48 = vpop.f32.mrf.mxu0  ;;  %1838 = vmatmul.mubr.bf16.gmra.mxu0 %v1630_v17  ;;  %2595 = vmatpush3.bf16.msra.mxu1 %v2932_v16 }
 0x1b0   :  { %v1571_v27 = vpop.f32.mrf.mxu1  ;;  %v1568_v18 = vadd.f32 %v1567_v6, %v1455_v34  ;;  %v1612_v11 = vmax.f32 %v1566_v13, 0.0  ;;  %v1459_v21 = vadd.f32 %v1458_v48, %v3263_v30  ;;  %v3402_v30 = vld [vmem:[#allocation19_spill] sm:$0xff] }
 0x1b1   :  { %v1460_v44 = vpop.f32.mrf.mxu0  ;;  %v1249_v32 = vadd.f32 %v3402_v30, %v3176_v63  ;;  %v2933_v48 = vld [vmem:[#allocation8 + $0x18] sm:$0xff]  }
 0x1b2   :  { %v1573_v50 = vpop.f32.mrf.mxu1  ;;  %v1613_v29 = vmax.f32 %v1568_v18, 0.0  ;;  %v1461_v33 = vadd.f32 %v1460_v44, %v3270_v40  ;;  %v1632_v41 = vpack.c.bf16 %v1612_v11, %v1610_v45  ;;  %v1572_v40 = vadd.f32 %v1571_v27, %v1459_v21  ;;  %2596 = vmatprep.subr.bf16.mxu1 %v2933_v48  ;;  %v2934_v27 = vld [vmem:[#allocation8 + $0x10] sm:$0xff]   ;;  %v2936_v18 = vld [vmem:[#allocation8] sm:$0xff]   ;;  %v2937_v11 = vld [vmem:[#allocation10 + $0x38] sm:$0xff]  }
 0x1b3   :  { %v1462_v37 = vpop.f32.mrf.mxu0  ;;  %v1362_v1 = vadd.f32 %v3406_v24, %v1249_v32  ;;  %2597 = vmatpush3.bf16.msra.mxu1 %v2933_v48  ;;  %v2940_v24 = vld [vmem:[#allocation10 + $0x20] sm:$0xff]  }
 0x1b4   :  { %v1575_v58 = vpop.f32.mrf.mxu1  ;;  %v1633_v31 = vpack.c.bf16 %v1613_v29, %v1611_v23  ;;  %v1463_v20 = vadd.f32 %v1462_v37, %v1350_v8  ;;  %v1574_v39 = vadd.f32 %v1573_v50, %v1461_v33  ;;  %v1614_v0 = vmax.f32 %v1572_v40, 0.0  ;;  %2598 = vmatprep.subr.bf16.mxu1 %v2934_v27  ;;  %v3357_v23 = vld [vmem:[%s3391_s4] ss:$0 sm:$0xff] }
 0x1b5   :  { %v1464_v35 = vpop.f32.mrf.mxu0 }
 0x1b6   :  { %v1577_v43 = vpop.f32.mrf.mxu1  ;;  %v1576_v36 = vadd.f32 %v1575_v58, %v1463_v20  ;;  %v1465_v61 = vadd.f32 %v1464_v35, %v1352_v28  ;;  %1845 = vmatprep.mubr.bf16.mxu0 %v1633_v31  ;;  %v1615_v55 = vmax.f32 %v1574_v39, 0.0 }
 0x1b7   :  { %v1468_v52 = vpop.f32.mrf.mxu0  ;;  %1846 = vmatmul.mubr.bf16.gmra.mxu0 %v1632_v41  ;;  %2599 = vmatpush3.bf16.msra.mxu1 %v2934_v27 }
 0x1b8   :  { %v1581_v25 = vpop.f32.mrf.mxu1  ;;  %v1578_v42 = vadd.f32 %v1577_v43, %v1465_v61  ;;  %v1616_v59 = vmax.f32 %v1576_v36, 0.0  ;;  %v1469_v54 = vadd.f32 %v1468_v52, %v3405_v22  ;;  %2600 = vmatprep.subr.bf16.mxu1 %v2935_v12 }
 0x1b9   :  { %v1470_v38 = vpop.f32.mrf.mxu0 }
 0x1ba   :  { %v1583_v2 = vpop.f32.mrf.mxu1  ;;  %v1617_v56 = vmax.f32 %v1578_v42, 0.0  ;;  %v1471_v57 = vadd.f32 %v1470_v38, %v3404_v62  ;;  %v1634_v63 = vpack.c.bf16 %v1616_v59, %v1614_v0  ;;  %v1582_v49 = vadd.f32 %v1581_v25, %v1469_v54  ;;  %v2938_v38 = vld [vmem:[#allocation10 + $0x30] sm:$0xff]   ;;  %v2939_v62 = vld [vmem:[#allocation10 + $0x28] sm:$0xff]  }
 0x1bb   :  { %v1472_v4 = vpop.f32.mrf.mxu0  ;;  %2601 = vmatpush3.bf16.msra.mxu1 %v2935_v12 }
 0x1bc   :  { %v1585_v46 = vpop.f32.mrf.mxu1  ;;  %v1635_v14 = vpack.c.bf16 %v1617_v56, %v1615_v55  ;;  %v1473_v7 = vadd.f32 %v1472_v4, %v1360_v53  ;;  %v1584_v26 = vadd.f32 %v1583_v2, %v1471_v57  ;;  %v1618_v15 = vmax.f32 %v1582_v49, 0.0  ;;  %2602 = vmatprep.subr.bf16.mxu1 %v2936_v18 }
 0x1bd   :  { %v1474_v19 = vpop.f32.mrf.mxu0 }
 0x1be   :  { %v1586_v3 = vadd.f32 %v1585_v46, %v1473_v7  ;;  %v1475_v10 = vadd.f32 %v1474_v19, %v1362_v1  ;;  %1853 = vmatprep.mubr.bf16.mxu0 %v1635_v14  ;;  %v1587_v9 = vpop.f32.mrf.mxu1  ;;  %v1619_v6 = vmax.f32 %v1584_v26, 0.0  ;;  %v2941_v26 = vld [vmem:[#allocation10 + $0x18] sm:$0xff]  }
 0x1bf   :  { %1854 = vmatmul.mubr.bf16.gmra.mxu0 %v1634_v63  ;;  %2603 = vmatpush3.bf16.msra.mxu1 %v2936_v18 }
 0x1c0   :  { %v1588_v17 = vadd.f32 %v1587_v9, %v1475_v10  ;;  %v1620_v5 = vmax.f32 %v1586_v3, 0.0  ;;  %2620 = vmatprep.subr.bf16.mxu1 %v2937_v11 }
 0x1c2   :  { %v1621_v47 = vmax.f32 %v1588_v17, 0.0  ;;  %v1636_v34 = vpack.c.bf16 %v1620_v5, %v1618_v15 }
 0x1c4   :  { %v1637_v13 = vpack.c.bf16 %v1621_v47, %v1619_v6 }
 0x1c6   :  { %1861 = vmatprep.mubr.bf16.mxu0 %v1637_v13 }
 0x1c7   :  { %1862 = vmatmul.mubr.bf16.gmra.mxu0 %v1636_v34 }
 0x24f   :  { %v2508_v44 = vpop.f32.mrf.mxu0 }
 0x251   :  { %v2509_v50 = vpop.f32.mrf.mxu0 }
 0x252   :  { %v2510_v8 = vadd.f32 %v2509_v50, %v2508_v44 }
 0x253   :  { %v2511_v29 = vpop.f32.mrf.mxu0 }
 0x254   :  { %v1808_v45 = vadd.f32 %v2510_v8, %v3357_v23 }
 0x255   :  { %v2512_v33 = vpop.f32.mrf.mxu0 }
 0x256   :  { %v2513_v21 = vadd.f32 %v2512_v33, %v2511_v29  ;;  %v1870_v31 = vmax.f32 %v1808_v45, 0.0 }
 0x257   :  { %v2514_v37 = vpop.f32.mrf.mxu0 }
 0x258   :  { %v1811_v58 = vadd.f32 %v2513_v21, %v3357_v23 }
 0x259   :  { %v2515_v28 = vpop.f32.mrf.mxu0 }
 0x25a   :  { %v1871_v20 = vmax.f32 %v1811_v58, 0.0  ;;  %v2516_v41 = vadd.f32 %v2515_v28, %v2514_v37 }
 0x25b   :  { %v2517_v35 = vpop.f32.mrf.mxu0 }
 0x25c   :  { %v1886_v43 = vpack.c.bf16 %v1871_v20, %v1870_v31  ;;  %v1816_v39 = vadd.f32 %v2516_v41, %v3357_v23 }
 0x25d   :  { %v2518_v51 = vpop.f32.mrf.mxu0 }
 0x25e   :  { %v2519_v36 = vadd.f32 %v2518_v51, %v2517_v35  ;;  %2604 = vmatprep.mubr.bf16.mxu1 %v1886_v43  ;;  %v1872_v25 = vmax.f32 %v1816_v39, 0.0 }
 0x25f   :  { %v2520_v61 = vpop.f32.mrf.mxu0 }
 0x260   :  { %v1819_v40 = vadd.f32 %v2519_v36, %v3357_v23 }
 0x261   :  { %v2521_v52 = vpop.f32.mrf.mxu0 }
 0x262   :  { %v1873_v30 = vmax.f32 %v1819_v40, 0.0  ;;  %v2522_v32 = vadd.f32 %v2521_v52, %v2520_v61 }
 0x263   :  { %v2523_v42 = vpop.f32.mrf.mxu0 }
 0x264   :  { %v1887_v59 = vpack.c.bf16 %v1873_v30, %v1872_v25  ;;  %v1824_v60 = vadd.f32 %v2522_v32, %v3357_v23 }
 0x265   :  { %v2524_v2 = vpop.f32.mrf.mxu0 }
 0x266   :  { %v2525_v53 = vadd.f32 %v2524_v2, %v2523_v42  ;;  %2605 = vmatmul.mubr.bf16.vlgmr.msra.gmra.mxu1 %v1887_v59  ;;  %v1874_v0 = vmax.f32 %v1824_v60, 0.0 }
 0x267   :  { %v2526_v55 = vpop.f32.mrf.mxu0  ;;  %2621 = vmatpush3.bf16.msra.mxu1 %v2937_v11 }
 0x268   :  { %v1827_v56 = vadd.f32 %v2525_v53, %v3357_v23  ;;  %2622 = vmatprep.subr.bf16.mxu1 %v2938_v38  ;;  %v2942_v53 = vld [vmem:[#allocation10 + $0x10] sm:$0xff]  }
 0x269   :  { %v2527_v57 = vpop.f32.mrf.mxu0 }
 0x26a   :  { %v1875_v22 = vmax.f32 %v1827_v56, 0.0  ;;  %v2528_v54 = vadd.f32 %v2527_v57, %v2526_v55  ;;  %v2943_v55 = vld [vmem:[#allocation10 + $0x8] sm:$0xff]   ;;  %v2944_v56 = vld [vmem:[#allocation10] sm:$0xff]  }
 0x26b   :  { %v2529_v4 = vpop.f32.mrf.mxu0  ;;  %2623 = vmatpush3.bf16.msra.mxu1 %v2938_v38 }
 0x26c   :  { %v1888_v46 = vpack.c.bf16 %v1875_v22, %v1874_v0  ;;  %2624 = vmatprep.subr.bf16.mxu1 %v2939_v62  ;;  %v1832_v14 = vadd.f32 %v2528_v54, %v3357_v23  ;;  %v2474_v0 = vld [vmem:[%s3393_s6] ss:$0 sm:$0xff] }
 0x26d   :  { %v2530_v1 = vpop.f32.mrf.mxu0 }
 0x26e   :  { %v2531_v7 = vadd.f32 %v2530_v1, %v2529_v4  ;;  %2608 = vmatprep.mubr.bf16.mxu1 %v1888_v46  ;;  %v1876_v10 = vmax.f32 %v1832_v14, 0.0 }
 0x26f   :  { %v2532_v63 = vpop.f32.mrf.mxu0  ;;  %2625 = vmatpush3.bf16.msra.mxu1 %v2939_v62 }
 0x270   :  { %v1835_v19 = vadd.f32 %v2531_v7, %v3357_v23  ;;  %2626 = vmatprep.subr.bf16.mxu1 %v2940_v24 }
 0x271   :  { %v2533_v3 = vpop.f32.mrf.mxu0 }
 0x272   :  { %v1877_v49 = vmax.f32 %v1835_v19, 0.0  ;;  %v2534_v9 = vadd.f32 %v2533_v3, %v2532_v63 }
 0x273   :  { %v2535_v17 = vpop.f32.mrf.mxu0  ;;  %2627 = vmatpush3.bf16.msra.mxu1 %v2940_v24 }
 0x274   :  { %v1889_v5 = vpack.c.bf16 %v1877_v49, %v1876_v10  ;;  %2628 = vmatprep.subr.bf16.mxu1 %v2941_v26  ;;  %v1840_v47 = vadd.f32 %v2534_v9, %v3357_v23 }
 0x275   :  { %v2536_v6 = vpop.f32.mrf.mxu0 }
 0x276   :  { %v2537_v15 = vadd.f32 %v2536_v6, %v2535_v17  ;;  %2609 = vmatmul.mubr.bf16.gmra.mxu1 %v1889_v5  ;;  %v1878_v48 = vmax.f32 %v1840_v47, 0.0 }
 0x277   :  { %v2538_v13 = vpop.f32.mrf.mxu0  ;;  %2629 = vmatpush3.bf16.msra.mxu1 %v2941_v26 }
 0x278   :  { %v1843_v34 = vadd.f32 %v2537_v15, %v3357_v23  ;;  %2630 = vmatprep.subr.bf16.mxu1 %v2942_v53 }
 0x279   :  { %v2539_v16 = vpop.f32.mrf.mxu0 }
 0x27a   :  { %v1879_v27 = vmax.f32 %v1843_v34, 0.0  ;;  %v2540_v12 = vadd.f32 %v2539_v16, %v2538_v13 }
 0x27b   :  { %v2541_v18 = vpop.f32.mrf.mxu0  ;;  %2631 = vmatpush3.bf16.msra.mxu1 %v2942_v53 }
 0x27c   :  { %v1890_v11 = vpack.c.bf16 %v1879_v27, %v1878_v48  ;;  %v1848_v50 = vadd.f32 %v2540_v12, %v3357_v23  ;;  %2632 = vmatprep.subr.bf16.mxu1 %v2943_v55 }
 0x27d   :  { %v2542_v44 = vpop.f32.mrf.mxu0 }
 0x27e   :  { %v2543_v8 = vadd.f32 %v2542_v44, %v2541_v18  ;;  %2612 = vmatprep.mubr.bf16.mxu1 %v1890_v11  ;;  %v1880_v21 = vmax.f32 %v1848_v50, 0.0 }
 0x27f   :  { %v2544_v29 = vpop.f32.mrf.mxu0  ;;  %2633 = vmatpush3.bf16.msra.mxu1 %v2943_v55 }
 0x280   :  { %v1851_v33 = vadd.f32 %v2543_v8, %v3357_v23  ;;  %2634 = vmatprep.subr.bf16.mxu1 %v2944_v56 }
 0x281   :  { %v2545_v45 = vpop.f32.mrf.mxu0 }
 0x282   :  { %v1881_v37 = vmax.f32 %v1851_v33, 0.0  ;;  %v2546_v58 = vadd.f32 %v2545_v45, %v2544_v29 }
 0x283   :  { %v2547_v28 = vpop.f32.mrf.mxu0  ;;  %2635 = vmatpush3.bf16.msra.mxu1 %v2944_v56 }
 0x284   :  { %v1891_v31 = vpack.c.bf16 %v1881_v37, %v1880_v21  ;;  %v1856_v41 = vadd.f32 %v2546_v58, %v3357_v23 }
 0x285   :  { %v2548_v20 = vpop.f32.mrf.mxu0 }
 0x286   :  { %v2549_v35 = vadd.f32 %v2548_v20, %v2547_v28  ;;  %2613 = vmatmul.mubr.bf16.gmra.mxu1 %v1891_v31  ;;  %v1882_v36 = vmax.f32 %v1856_v41, 0.0 }
 0x287   :  { %v2550_v43 = vpop.f32.mrf.mxu0 }
 0x288   :  { %v1859_v51 = vadd.f32 %v2549_v35, %v3357_v23 }
 0x289   :  { %v2551_v39 = vpop.f32.mrf.mxu0 }
 0x28a   :  { %v1883_v61 = vmax.f32 %v1859_v51, 0.0  ;;  %v2552_v40 = vadd.f32 %v2551_v39, %v2550_v43 }
 0x28b   :  { %v2553_v52 = vpop.f32.mrf.mxu0 }
 0x28c   :  { %v1892_v25 = vpack.c.bf16 %v1883_v61, %v1882_v36  ;;  %v1864_v32 = vadd.f32 %v2552_v40, %v3357_v23 }
 0x28d   :  { %v2554_v30 = vpop.f32.mrf.mxu0 }
 0x28e   :  { %v2555_v42 = vadd.f32 %v2554_v30, %v2553_v52  ;;  %2616 = vmatprep.mubr.bf16.mxu1 %v1892_v25  ;;  %v1884_v38 = vmax.f32 %v1864_v32, 0.0 }
 0x290   :  { %v1867_v59 = vadd.f32 %v2555_v42, %v3357_v23 }
 0x292   :  { %v1885_v2 = vmax.f32 %v1867_v59, 0.0  ;;  %v2483_v59 = vld [vmem:[%s3395_s8] ss:$0 sm:$0xff]  ;;  %s3085_s8 = smov [#allocation11]  }
 0x293   :  { %s2275_s21 = sshll.u32 %s3085_s8, 4  ;;  %s2276_s21 = int_to_ptr.vmem [resolvable:$true] %s2275_s21 }
 0x294   :  { %v1893_v60 = vpack.c.bf16 %v1885_v2, %v1884_v38  ;;  %s3045_s22 = scalar_lea.vmem %s2276_s21, 2048  ;;  %p3050_p12 = scmp.lt.s32.totalorder %s2276_s21, %s2276_s21 }
 0x295   :  { %p3046_p11 = scmp.ne.s32.totalorder %s2276_s21, %s3045_s22  ;;  %p3051_p13 = scmp.lt.s32.totalorder %s3045_s22, %s3045_s22 }
 0x296   :  { %2617 = vmatmul.mubr.bf16.gmra.mxu1 %v1893_v60 }
 0x297   :  { %p3052_p0 = por %p3051_p13, %p3050_p12 }
 0x299   :  { %p3053_p1 = pnand %p3052_p0, %p3046_p11 }
 0x326   :  { %v2606_v62 = vpop.f32.mrf.mxu1 }
 0x327   :  { %v2008_v4 = vadd.f32 %v2606_v62, %v2474_v0 }
 0x328   :  { %v1999_v57 = vpop.f32.mrf.mxu1 }
 0x329   :  { %v2000_v22 = vadd.f32 %v2474_v0, %v1999_v57  ;;  %v2064_v63 = vmax.f32 %v2008_v4, 0.0 }
 0x32a   :  { %v2607_v23 = vpop.f32.mrf.mxu1 }
 0x32b   :  { %v2011_v54 = vadd.f32 %v2607_v23, %v2474_v0  ;;  %v2062_v14 = vmax.f32 %v2000_v22, 0.0 }
 0x32c   :  { %v2002_v46 = vpop.f32.mrf.mxu1 }
 0x32d   :  { %v2003_v24 = vadd.f32 %v2474_v0, %v2002_v46  ;;  %v2065_v1 = vmax.f32 %v2011_v54, 0.0 }
 0x32f   :  { %v2063_v7 = vmax.f32 %v2003_v24, 0.0  ;;  %v2079_v26 = vpack.c.bf16 %v2065_v1, %v2064_v63 }
 0x331   :  { %v2078_v19 = vpack.c.bf16 %v2063_v7, %v2062_v14 }
 0x333   :  { %2636 = vmatprep.mubr.bf16.mxu1 %v2078_v19 }
 0x334   :  { %2637 = vmatmul.mubr.bf16.vlgmr.msra.gmra.mxu1 %v2079_v26 }
 0x336   :  { %v2610_v3 = vpop.f32.mrf.mxu1 }
 0x337   :  { %v2024_v5 = vadd.f32 %v2610_v3, %v2474_v0 }
 0x338   :  { %v2015_v10 = vpop.f32.mrf.mxu1 }
 0x339   :  { %v2016_v9 = vadd.f32 %v2474_v0, %v2015_v10  ;;  %v2068_v16 = vmax.f32 %v2024_v5, 0.0 }
 0x33a   :  { %v2611_v49 = vpop.f32.mrf.mxu1 }
 0x33b   :  { %v2027_v17 = vadd.f32 %v2611_v49, %v2474_v0  ;;  %v2066_v13 = vmax.f32 %v2016_v9, 0.0 }
 0x33c   :  { %v2018_v6 = vpop.f32.mrf.mxu1 }
 0x33d   :  { %v2019_v47 = vadd.f32 %v2474_v0, %v2018_v6  ;;  %v2069_v15 = vmax.f32 %v2027_v17, 0.0 }
 0x33f   :  { %v2067_v34 = vmax.f32 %v2019_v47, 0.0  ;;  %v2081_v27 = vpack.c.bf16 %v2069_v15, %v2068_v16 }
 0x341   :  { %v2080_v48 = vpack.c.bf16 %v2067_v34, %v2066_v13 }
 0x343   :  { %2640 = vmatprep.mubr.bf16.mxu1 %v2080_v48 }
 0x344   :  { %2641 = vmatmul.mubr.bf16.gmra.mxu1 %v2081_v27 }
 0x346   :  { %v2614_v12 = vpop.f32.mrf.mxu1 }
 0x347   :  { %v2040_v8 = vadd.f32 %v2614_v12, %v2474_v0 }
 0x348   :  { %v2031_v18 = vpop.f32.mrf.mxu1 }
 0x349   :  { %v2032_v44 = vadd.f32 %v2474_v0, %v2031_v18  ;;  %v2072_v58 = vmax.f32 %v2040_v8, 0.0 }
 0x34a   :  { %v2615_v11 = vpop.f32.mrf.mxu1 }
 0x34b   :  { %v2043_v50 = vadd.f32 %v2615_v11, %v2474_v0  ;;  %v2070_v21 = vmax.f32 %v2032_v44, 0.0 }
 0x34c   :  { %v2034_v29 = vpop.f32.mrf.mxu1 }
 0x34d   :  { %v2035_v33 = vadd.f32 %v2474_v0, %v2034_v29  ;;  %v2073_v45 = vmax.f32 %v2043_v50, 0.0 }
 0x34f   :  { %v2071_v37 = vmax.f32 %v2035_v33, 0.0  ;;  %v2083_v31 = vpack.c.bf16 %v2073_v45, %v2072_v58 }
 0x351   :  { %v2082_v28 = vpack.c.bf16 %v2071_v37, %v2070_v21 }
 0x353   :  { %2644 = vmatprep.mubr.bf16.mxu1 %v2082_v28 }
 0x354   :  { %2645 = vmatmul.mubr.bf16.gmra.mxu1 %v2083_v31 }
 0x356   :  { %v2618_v20 = vpop.f32.mrf.mxu1 }
 0x357   :  { %v2056_v39 = vadd.f32 %v2618_v20, %v2474_v0 }
 0x358   :  { %v2047_v41 = vpop.f32.mrf.mxu1 }
 0x359   :  { %v2048_v43 = vadd.f32 %v2474_v0, %v2047_v41  ;;  %v2076_v30 = vmax.f32 %v2056_v39, 0.0 }
 0x35a   :  { %v2619_v35 = vpop.f32.mrf.mxu1 }
 0x35b   :  { %v2059_v51 = vadd.f32 %v2619_v35, %v2474_v0  ;;  %v2074_v52 = vmax.f32 %v2048_v43, 0.0 }
 0x35c   :  { %v2050_v36 = vpop.f32.mrf.mxu1 }
 0x35d   :  { %v2051_v61 = vadd.f32 %v2474_v0, %v2050_v36  ;;  %v2077_v40 = vmax.f32 %v2059_v51, 0.0 }
 0x35f   :  { %v2075_v25 = vmax.f32 %v2051_v61, 0.0  ;;  %v2085_v42 = vpack.c.bf16 %v2077_v40, %v2076_v30 }
 0x361   :  { %v2084_v32 = vpack.c.bf16 %v2075_v25, %v2074_v52 }
 0x363   :  { %2648 = vmatprep.mubr.bf16.mxu1 %v2084_v32 }
 0x364   :  { %2649 = vmatmul.mubr.bf16.gmra.mxu1 %v2085_v42 }
 0x3f4   :  { %v2638_v38 = vpop.f32.mrf.mxu1 }
 0x3f5   :  { %v2200_v2 = vadd.f32 %v2638_v38, %v2483_v59 }
 0x3f6   :  { %v2191_v60 = vpop.f32.mrf.mxu1 }
 0x3f7   :  { %2256 = vst [vmem:[#allocation11 + $0x10] sm:$0xff] %v2200_v2  ;;  %v2192_v53 = vadd.f32 %v2483_v59, %v2191_v60 }
 0x3f8   :  { %v2639_v55 = vpop.f32.mrf.mxu1 }
 0x3f9   :  { %2254 = vst [vmem:[#allocation11] sm:$0xff] %v2192_v53  ;;  %v2203_v56 = vadd.f32 %v2639_v55, %v2483_v59 }
 0x3fa   :  { %v2194_v62 = vpop.f32.mrf.mxu1 }
 0x3fb   :  { %2257 = vst [vmem:[#allocation11 + $0x18] sm:$0xff] %v2203_v56  ;;  %v2195_v57 = vadd.f32 %v2483_v59, %v2194_v62 }
 0x3fd   :  { %2255 = vst [vmem:[#allocation11 + $0x8] sm:$0xff] %v2195_v57 }
 0x404   :  { %v2642_v0 = vpop.f32.mrf.mxu1 }
 0x405   :  { %v2216_v23 = vadd.f32 %v2642_v0, %v2483_v59 }
 0x406   :  { %v2207_v22 = vpop.f32.mrf.mxu1 }
 0x407   :  { %2260 = vst [vmem:[#allocation11 + $0x30] sm:$0xff] %v2216_v23  ;;  %v2208_v54 = vadd.f32 %v2483_v59, %v2207_v22 }
 0x408   :  { %v2643_v4 = vpop.f32.mrf.mxu1 }
 0x409   :  { %2258 = vst [vmem:[#allocation11 + $0x20] sm:$0xff] %v2208_v54  ;;  %v2219_v46 = vadd.f32 %v2643_v4, %v2483_v59 }
 0x40a   :  { %v2210_v24 = vpop.f32.mrf.mxu1 }
 0x40b   :  { %2261 = vst [vmem:[#allocation11 + $0x38] sm:$0xff] %v2219_v46  ;;  %v2211_v1 = vadd.f32 %v2483_v59, %v2210_v24 }
 0x40d   :  { %2259 = vst [vmem:[#allocation11 + $0x28] sm:$0xff] %v2211_v1 }
 0x414   :  { %v2646_v14 = vpop.f32.mrf.mxu1 }
 0x415   :  { %v2232_v7 = vadd.f32 %v2646_v14, %v2483_v59 }
 0x416   :  { %v2223_v63 = vpop.f32.mrf.mxu1 }
 0x417   :  { %2264 = vst [vmem:[#allocation11 + $0x50] sm:$0xff] %v2232_v7  ;;  %v2224_v19 = vadd.f32 %v2483_v59, %v2223_v63 }
 0x418   :  { %v2647_v26 = vpop.f32.mrf.mxu1 }
 0x419   :  { %2262 = vst [vmem:[#allocation11 + $0x40] sm:$0xff] %v2224_v19  ;;  %v2235_v3 = vadd.f32 %v2647_v26, %v2483_v59 }
 0x41a   :  { %v2226_v10 = vpop.f32.mrf.mxu1 }
 0x41b   :  { %2265 = vst [vmem:[#allocation11 + $0x58] sm:$0xff] %v2235_v3  ;;  %v2227_v49 = vadd.f32 %v2483_v59, %v2226_v10 }
 0x41d   :  { %2263 = vst [vmem:[#allocation11 + $0x48] sm:$0xff] %v2227_v49 }
 0x424   :  { %v2650_v9 = vpop.f32.mrf.mxu1 }
 0x425   :  { %v2248_v17 = vadd.f32 %v2650_v9, %v2483_v59 }
 0x426   :  { %v2239_v5 = vpop.f32.mrf.mxu1 }
 0x427   :  { %2268 = vst [vmem:[#allocation11 + $0x70] sm:$0xff] %v2248_v17  ;;  %v2240_v6 = vadd.f32 %v2483_v59, %v2239_v5 }
 0x428   :  { %v2651_v47 = vpop.f32.mrf.mxu1 }
 0x429   :  { %2266 = vst [vmem:[#allocation11 + $0x60] sm:$0xff] %v2240_v6  ;;  %v2251_v15 = vadd.f32 %v2651_v47, %v2483_v59 }
 0x42a   :  { %v2242_v13 = vpop.f32.mrf.mxu1 }
 0x42b   :  { %2269 = vst [vmem:[#allocation11 + $0x78] sm:$0xff] %v2251_v15  ;;  %v2243_v34 = vadd.f32 %v2483_v59, %v2242_v13 }
 0x42d   :  { %2267 = vst [vmem:[#allocation11 + $0x68] sm:$0xff] %v2243_v34 }
 0x42e   :  { %3056 = shalt.err (!%p3053_p1)
}
 0x42f   :  { %2281 = dma.vmem_to_hbm [thread:$0]  %s2276_s21, 2048, %s3396_s9, [#allocation4], %s3074_s12, %s3074_s12, %s3075_s13  }
 0x430   :  { %3071 = dma.done.wait [#allocation4], 2048  }
 0x431   :  { %3072 = vsyncadd [#allocation4], 4294965248 }
 0x432   :  { %2285 = vsyncpa [#allocation3], 1 }
 0x433   :  { %2286 = vsyncpa [#allocation6], 1 }
 0x434   :  { %2287 = vsyncpa [#allocation9], 1 }
 0x435   :  { %2288 = vsyncpa [#allocation4], 1 }

</bundles_post_ra>
